<compile_context>
chip_gen: v6e
topology: v6e:2x2x1
jax: 0.10.0
libtpu: 0.0.40
codegen_flags: <defaults>
</compile_context>

<pallas_src>
import math
import functools

import jax
import jax.numpy as jnp
from jax import lax
from jax.experimental import pallas as pl
from jax.experimental.pallas import tpu as pltpu


_COMPUTE_DTYPE = jnp.bfloat16      # MXU input dtype; accumulation is always f32
_APPROX_RECIPROCAL = True          # EUP vrcp for softmax denom (~1e-3 rel err)


def _vmem_limit_bytes():
    """Generation-aware scoped-VMEM budget: half of physical, capped at 64 MiB."""
    try:
        cap = pltpu.get_tpu_info().vmem_capacity_bytes
        return int(min(cap // 2, 64 * 1024 * 1024))
    except Exception:
        return 32 * 1024 * 1024


def _pick_tile(dim, target, quantum):
    """Largest multiple of `quantum` <= target that divides `dim`, else `dim`."""
    if dim <= target:
        return dim
    t = (min(target, dim) // quantum) * quantum
    while t >= quantum:
        if dim % t == 0:
            return t
        t -= quantum
    return dim


# ----------------------------- Pallas kernels ------------------------------ #

def _linear_kernel(x_ref, w_ref, b_ref, o_ref, acc_ref):
    """One (i, j) tile of out = x @ w + b, reduced over the trailing k axis.

    Blocks: x (tm, tk) bf16, w (tk, tn) bf16, b (1, tn) f32, o (1, tm, tn),
            acc scratch (tm, tn) f32.  Grid: (M//tm, N//tn, K//tk).
    """
    @pl.when(pl.program_id(2) == 0)
    def _init():
        acc_ref[...] = jnp.zeros_like(acc_ref)

    acc_ref[...] += jnp.dot(x_ref[...], w_ref[...],
                            preferred_element_type=jnp.float32)

    @pl.when(pl.program_id(2) == pl.num_programs(2) - 1)
    def _flush():
        o_ref[0] = (acc_ref[...] + b_ref[...]).astype(o_ref.dtype)


def _grouped_linear_kernel(x_ref, w_ref, b_ref, o_ref, acc_ref):
    """Grouped variant: out[g] = x[g] @ w[g] + b[g].

    Blocks: x (1, tm, tk), w (1, tk, tn), b (1, 1, tn), o (1, tm, tn).
    Grid: (G, M//tm, N//tn, K//tk), reduction axis last.
    """
    @pl.when(pl.program_id(3) == 0)
    def _init():
        acc_ref[...] = jnp.zeros_like(acc_ref)

    acc_ref[...] += jnp.dot(x_ref[0], w_ref[0],
                            preferred_element_type=jnp.float32)

    @pl.when(pl.program_id(3) == pl.num_programs(3) - 1)
    def _flush():
        o_ref[0] = (acc_ref[...] + b_ref[0]).astype(o_ref.dtype)


def _flash_mha_kernel(q_ref, k_ref, v_ref, o_ref, m_ref, l_ref, acc_ref, *,
                      n_heads):
    """One (batch, q-tile, kv-tile) step of online-softmax multi-head attention.

    q block (1, 1, tq, D) bf16 (1/sqrt(d_k) already folded into Wq),
    k/v blocks (1, 1, tkv, D) bf16.
    Scratch: m/l (n_heads, tq, 1) f32 running max / sum,
             acc (tq, D) f32 unnormalized per-head outputs.
    """
    kv = pl.program_id(2)

    @pl.when(kv == 0)
    def _init():
        m_ref[...] = jnp.full_like(m_ref, -jnp.inf)
        l_ref[...] = jnp.zeros_like(l_ref)
        acc_ref[...] = jnp.zeros_like(acc_ref)

    q = q_ref[0, 0]                              # (tq, D)
    k = k_ref[0, 0]                              # (tkv, D)
    v = v_ref[0, 0]                              # (tkv, D)

    d_model = q.shape[-1]
    d_k = d_model // n_heads

    # TODO(synk): when d_k is not a multiple of 128 the per-head column slices
    #             relayout across lanes; a head grid axis (for d_k >= 128) or a
    #             single einshape to (H, tq, d_k) would remove them.
    for h in range(n_heads):                     # static unroll; n_heads small
        sl = slice(h * d_k, (h + 1) * d_k)
        # QK^T contracting over d_k on both operands (no in-kernel transpose).
        s = lax.dot_general(
            q[:, sl], k[:, sl],
            dimension_numbers=(((1,), (1,)), ((), ())),
            preferred_element_type=jnp.float32)                 # (tq, tkv) f32
        m_prev = m_ref[h]                                       # (tq, 1)
        m_new = jnp.maximum(m_prev, jnp.max(s, axis=-1, keepdims=True))
        alpha = jnp.exp(m_prev - m_new)
        p = jnp.exp(s - m_new)                                  # unnormalized
        l_ref[h] = alpha * l_ref[h] + jnp.sum(p, axis=-1, keepdims=True)
        pv = jnp.dot(p.astype(v.dtype), v[:, sl],
                     preferred_element_type=jnp.float32)        # (tq, d_k) f32
        acc_ref[:, sl] = alpha * acc_ref[:, sl] + pv
        m_ref[h] = m_new

    @pl.when(kv == pl.num_programs(2) - 1)
    def _flush():
        # Deferred softmax normalization: scale the (tq, d_k) accumulators,
        # not the (tq, tkv) probability matrices.
        for h in range(n_heads):
            sl = slice(h * d_k, (h + 1) * d_k)
            acc_ref[:, sl] = acc_ref[:, sl] * pl.reciprocal(
                l_ref[h], approx=_APPROX_RECIPROCAL)
        o_ref[0] = acc_ref[...].astype(o_ref.dtype)   # lane-dense (tq, D) store


# ------------------------------ Python glue -------------------------------- #

def fused_linear(x, w, b, *, n_groups, out_dtype,
                 tm_target=512, tn_target=1024, tk_target=512):
    """out[g] = x @ w[:, g*Do:(g+1)*Do] + b[:, g*Do:(g+1)*Do].

    x: (M, K) bf16; w: (K, n_groups*Do) bf16; b: (1, n_groups*Do) f32.
    Returns (n_groups, M, Do): the n-tile index is mapped onto (group, col) so
    the fused QKV tensor is written directly in (3, M, d_model) layout.
    """
    M, K = x.shape
    n_total = w.shape[1]
    d_out = n_total // n_groups

    tm = _pick_tile(M, tm_target, 8)
    if tm > tm_target:                     # no divisor: pad rows, keep tiles small
        m_pad = pl.cdiv(M, tm_target) * tm_target
        x = jnp.pad(x, ((0, m_pad - M), (0, 0)))
        tm = tm_target
    m_rows = x.shape[0]
    tk = _pick_tile(K, tk_target, 128)
    tn = _pick_tile(d_out, tn_target, 128)
    npb = d_out // tn                      # n-tiles per group

    if npb == 1:
        out_map = lambda i, j, k: (j, i, 0)
    else:
        out_map = lambda i, j, k: (j // npb, i, j % npb)

    grid = (m_rows // tm, n_total // tn, K // tk)
    bytes_accessed = (x.size * x.dtype.itemsize + w.size * w.dtype.itemsize
                      + b.size * b.dtype.itemsize
                      + n_groups * m_rows * d_out * jnp.dtype(out_dtype).itemsize)

    out = pl.pallas_call(
        _linear_kernel,
        out_shape=jax.ShapeDtypeStruct((n_groups, m_rows, d_out), out_dtype),
        grid=grid,
        in_specs=[
            pl.BlockSpec((tm, tk), lambda i, j, k: (i, k)),
            pl.BlockSpec((tk, tn), lambda i, j, k: (k, j)),
            pl.BlockSpec((1, tn), lambda i, j, k: (0, j)),
        ],
        out_specs=pl.BlockSpec((1, tm, tn), out_map),
        scratch_shapes=[pltpu.VMEM((tm, tn), jnp.float32)],
        compiler_params=pltpu.CompilerParams(
            dimension_semantics=("parallel", "parallel", "arbitrary"),
            vmem_limit_bytes=_vmem_limit_bytes()),
        cost_estimate=pl.CostEstimate(
            flops=2 * m_rows * K * n_total, transcendentals=0,
            bytes_accessed=bytes_accessed),
    )(x, w, b)
    if m_rows != M:
        out = out[:, :M, :]
    return out


def grouped_linear(xs, ws, bs, *, out_dtype,
                   tm_target=512, tn_target=1024, tk_target=512):
    """out[g] = xs[g] @ ws[g] + bs[g].
    xs: (G, M, K) bf16, ws: (G, K, N) bf16, bs: (G, 1, N) f32 -> (G, M, N)."""
    G, M, K = xs.shape
    N = ws.shape[-1]

    tm = _pick_tile(M, tm_target, 8)
    if tm > tm_target:
        m_pad = pl.cdiv(M, tm_target) * tm_target
        xs = jnp.pad(xs, ((0, 0), (0, m_pad - M), (0, 0)))
        tm = tm_target
    m_rows = xs.shape[1]
    tk = _pick_tile(K, tk_target, 128)
    tn = _pick_tile(N, tn_target, 128)

    bytes_accessed = (xs.size * xs.dtype.itemsize + ws.size * ws.dtype.itemsize
                      + bs.size * bs.dtype.itemsize
                      + G * m_rows * N * jnp.dtype(out_dtype).itemsize)

    out = pl.pallas_call(
        _grouped_linear_kernel,
        out_shape=jax.ShapeDtypeStruct((G, m_rows, N), out_dtype),
        grid=(G, m_rows // tm, N // tn, K // tk),
        in_specs=[
            pl.BlockSpec((1, tm, tk), lambda g, i, j, k: (g, i, k)),
            pl.BlockSpec((1, tk, tn), lambda g, i, j, k: (g, k, j)),
            pl.BlockSpec((1, 1, tn), lambda g, i, j, k: (g, 0, j)),
        ],
        out_specs=pl.BlockSpec((1, tm, tn), lambda g, i, j, k: (g, i, j)),
        scratch_shapes=[pltpu.VMEM((tm, tn), jnp.float32)],
        compiler_params=pltpu.CompilerParams(
            dimension_semantics=("parallel", "parallel", "parallel", "arbitrary"),
            vmem_limit_bytes=_vmem_limit_bytes()),
        cost_estimate=pl.CostEstimate(
            flops=2 * G * m_rows * K * N, transcendentals=0,
            bytes_accessed=bytes_accessed),
    )(xs, ws, bs)
    if m_rows != M:
        out = out[:, :M, :]
    return out


def flash_multi_head_attention(qkv, n_heads, *, tq=512, tkv=512):
    """qkv: (3, B, S, d_model) bf16 -> (B, S, d_model) bf16 attention output."""
    _, B, S, d_model = qkv.shape
    tq = _pick_tile(S, tq, 8)
    tkv = _pick_tile(S, tkv, 8)
    # TODO(synk): non-divisible S falls back to full-S tiles; a masked ragged
    #             tail would keep tiles bounded for awkward sequence lengths.

    kernel = functools.partial(_flash_mha_kernel, n_heads=n_heads)
    out_dtype = qkv.dtype
    bytes_accessed = (qkv.size * qkv.dtype.itemsize
                      + B * S * d_model * jnp.dtype(out_dtype).itemsize)

    return pl.pallas_call(
        kernel,
        out_shape=jax.ShapeDtypeStruct((B, S, d_model), out_dtype),
        grid=(B, S // tq, S // tkv),
        in_specs=[
            # The same fused QKV tensor is passed three times; the projection
            # index is baked into each index_map (no HBM split / transpose).
            pl.BlockSpec((1, 1, tq, d_model), lambda b, qi, kv: (0, b, qi, 0)),
            pl.BlockSpec((1, 1, tkv, d_model), lambda b, qi, kv: (1, b, kv, 0)),
            pl.BlockSpec((1, 1, tkv, d_model), lambda b, qi, kv: (2, b, kv, 0)),
        ],
        out_specs=pl.BlockSpec((1, tq, d_model), lambda b, qi, kv: (b, qi, 0)),
        scratch_shapes=[
            pltpu.VMEM((n_heads, tq, 1), jnp.float32),   # running max
            pltpu.VMEM((n_heads, tq, 1), jnp.float32),   # running sum
            pltpu.VMEM((tq, d_model), jnp.float32),      # unnormalized output
        ],
        compiler_params=pltpu.CompilerParams(
            dimension_semantics=("parallel", "parallel", "arbitrary"),
            vmem_limit_bytes=_vmem_limit_bytes()),
        cost_estimate=pl.CostEstimate(
            flops=4 * B * S * S * d_model,
            transcendentals=B * n_heads * S * S,
            bytes_accessed=bytes_accessed),
    )(qkv, qkv, qkv)


def prepare_params(params, n_heads):
    """One-time weight prep (hoisted out of the jitted forward): transpose to
    (in, out), cast to bf16, fold 1/sqrt(d_k) into Wq/bq, and build both the
    concatenated [Wq|Wk|Wv] (self-attention fast path) and stacked forms."""
    d_model = params["wq"].shape[0]
    assert d_model % n_heads == 0
    scale = 1.0 / math.sqrt(d_model // n_heads)
    cdt = _COMPUTE_DTYPE

    wq_t = (params["wq"] * scale).T        # fold the 1/sqrt(d_k) scale into Wq
    bq = params["bq"] * scale
    wk_t, wv_t, wo_t = params["wk"].T, params["wv"].T, params["wo"].T

    return {
        "w_qkv_cat": jnp.concatenate([wq_t, wk_t, wv_t], axis=1).astype(cdt),
        "b_qkv_cat": jnp.concatenate([bq, params["bk"], params["bv"]]
                                     ).reshape(1, 3 * d_model).astype(jnp.float32),
        "w_qkv_stk": jnp.stack([wq_t, wk_t, wv_t], axis=0).astype(cdt),
        "b_qkv_stk": jnp.stack([bq, params["bk"], params["bv"]], axis=0
                               ).reshape(3, 1, d_model).astype(jnp.float32),
        "w_out": wo_t.astype(cdt),
        "b_out": params["bo"].reshape(1, d_model).astype(jnp.float32),
    }


@functools.partial(jax.jit, static_argnames=("n_heads", "tq", "tkv"))
def _forward_self(x, prepared, n_heads, tq=512, tkv=512):
    """Self-attention fast path (q = k = v = x): one wide-N QKV projection."""
    B, S, d_model = x.shape
    x2d = x.reshape(B * S, d_model).astype(_COMPUTE_DTYPE)
    qkv = fused_linear(x2d, prepared["w_qkv_cat"], prepared["b_qkv_cat"],
                       n_groups=3, out_dtype=_COMPUTE_DTYPE)      # (3, B*S, D)
    qkv = qkv.reshape(3, B, S, d_model)
    attn = flash_multi_head_attention(qkv, n_heads, tq=tq, tkv=tkv)
    out = fused_linear(attn.reshape(B * S, d_model), prepared["w_out"],
                       prepared["b_out"], n_groups=1, out_dtype=jnp.float32)
    return out.reshape(B, S, d_model)


@functools.partial(jax.jit, static_argnames=("n_heads", "tq", "tkv"))
def _forward_cross(query, key, value, prepared, n_heads, tq=512, tkv=512):
    """General path: distinct q/k/v activations, stacked (G=3) QKV projection."""
    B, S, d_model = query.shape
    xs = jnp.stack([query, key, value], axis=0).reshape(
        3, B * S, d_model).astype(_COMPUTE_DTYPE)
    qkv = grouped_linear(xs, prepared["w_qkv_stk"], prepared["b_qkv_stk"],
                         out_dtype=_COMPUTE_DTYPE)                # (3, B*S, D)
    qkv = qkv.reshape(3, B, S, d_model)
    attn = flash_multi_head_attention(qkv, n_heads, tq=tq, tkv=tkv)
    out = fused_linear(attn.reshape(B * S, d_model), prepared["w_out"],
                       prepared["b_out"], n_groups=1, out_dtype=jnp.float32)
    return out.reshape(B, S, d_model)


def absolute_multi_headed_attention(query, key, value, prepared, n_heads,
                                    *, tq=512, tkv=512):
    """Forward pass equivalent to AbsoluteMultiHeadedAttention.forward
    (mask=None, eval mode: dropout is identity)."""
    d_model = query.shape[-1]
    if (query is key) and (key is value) and d_model % 128 == 0:
        return _forward_self(query, prepared, n_heads=n_heads, tq=tq, tkv=tkv)
    return _forward_cross(query, key, value, prepared, n_heads=n_heads,
                          tq=tq, tkv=tkv)


def init_params(key, d_model):
    """Deterministic nn.Linear-style init: uniform(-1/sqrt(d_in), 1/sqrt(d_in))."""
    bound = 1.0 / math.sqrt(d_model)
    names = ["wq", "bq", "wk", "bk", "wv", "bv", "wo", "bo"]
    keys = jax.random.split(key, len(names))
    params = {}
    for name, k in zip(names, keys):
        shape = (d_model, d_model) if name.startswith("w") else (d_model,)
        params[name] = jax.random.uniform(
            k, shape, jnp.float32, minval=-bound, maxval=bound)
    return params


def _reference(query, key, value, params, n_heads):
    """Pure-JAX reference mirroring the kernel's precision choices
    (bf16 MXU inputs, f32 accumulation, bf16 activation storage, scale folded
    into Wq before the bf16 cast)."""
    B, S, d_model = query.shape
    d_k = d_model // n_heads
    cdt = _COMPUTE_DTYPE
    scale = 1.0 / math.sqrt(d_k)

    def lin(x, w, b):
        return jnp.dot(x.astype(cdt), w.T.astype(cdt),
                       preferred_element_type=jnp.float32) + b

    def proj(x, w, b):
        y = lin(x.reshape(B * S, d_model), w, b).astype(cdt)
        return y.reshape(B, S, n_heads, d_k).transpose(0, 2, 1, 3)

    q = proj(query, params["wq"] * scale, params["bq"] * scale)
    k = proj(key, params["wk"], params["bk"])
    v = proj(value, params["wv"], params["bv"])
    scores = jnp.einsum("bhqd,bhkd->bhqk", q, k,
                        preferred_element_type=jnp.float32)
    p = jax.nn.softmax(scores, axis=-1)
    x = jnp.einsum("bhqk,bhkd->bhqd", p.astype(cdt), v,
                   preferred_element_type=jnp.float32).astype(cdt)
    x = x.transpose(0, 2, 1, 3).reshape(B * S, d_model)
    return lin(x, params["wo"], params["bo"]).reshape(B, S, d_model)


# --------------------------------- main ------------------------------------ #

if __name__ == "__main__":
    def run_case(name, B, S, n_heads, d_model, self_attention, tq, tkv, rng):
        k_q, k_k, k_v, k_p = jax.random.split(rng, 4)
        query = jax.random.normal(k_q, (B, S, d_model), jnp.float32)
        if self_attention:
            key_t, value = query, query
        else:
            key_t = jax.random.normal(k_k, (B, S, d_model), jnp.float32)
            value = jax.random.normal(k_v, (B, S, d_model), jnp.float32)
        params = init_params(k_p, d_model)
        prepared = prepare_params(params, n_heads)

        out = jax.block_until_ready(
            absolute_multi_headed_attention(query, key_t, value, prepared,
                                            n_heads, tq=tq, tkv=tkv))
        ref = _reference(query, key_t, value, params, n_heads)
        assert out.shape == (B, S, d_model)
        err = float(jnp.max(jnp.abs(out - ref)))
        # bf16 MXU inputs + approx reciprocal => compare against the
        # precision-matched reference with a matching tolerance.
        assert jnp.allclose(out, ref, atol=2e-2, rtol=2e-2), (
            f"{name}: mismatch vs JAX reference (max abs err {err})")

    root = jax.random.PRNGKey(0)
    k1, k2 = jax.random.split(root)

    # Cross-attention at tiny shapes (stacked G=3 projection path).
    run_case("cross", B=2, S=8, n_heads=4, d_model=32, self_attention=False,
             tq=8, tkv=8, rng=k1)
    # Self-attention fast path (wide-N fused QKV GEMM) with a multi-step
    # online softmax (2 q-tiles x 2 kv-tiles per batch element).
    run_case("self", B=2, S=32, n_heads=4, d_model=128, self_attention=True,
             tq=16, tkv=16, rng=k2)

    print("KERNEL_OK")
</pallas_src>

<mosaic_0001>
module attributes {stable_mosaic.version = 11 : i64} {
  func.func @_grouped_linear_kernel(%arg0: i32, %arg1: i32, %arg2: i32, %arg3: i32, %arg4: memref<1x16x32xbf16, #tpu.memory_space<vmem>>, %arg5: memref<1x32x32xbf16, #tpu.memory_space<vmem>>, %arg6: memref<1x1x32xf32, #tpu.memory_space<vmem>>, %arg7: memref<1x16x32xbf16, #tpu.memory_space<vmem>>, %arg8: memref<16x32xf32, #tpu.memory_space<vmem>>) attributes {dimension_semantics = [#tpu.dimension_semantics<parallel>, #tpu.dimension_semantics<parallel>, #tpu.dimension_semantics<parallel>, #tpu.dimension_semantics<arbitrary>], iteration_bounds = array<i64: 3, 1, 1, 1>, scalar_prefetch = 0 : i64, scratch_operands = 1 : i64, tpu.core_type = #tpu.core_type<tc>, window_params = [{transform_indices = @transform_0, window_bounds = array<i64: 1, 16, 32>}, {transform_indices = @transform_1, window_bounds = array<i64: 1, 32, 32>}, {transform_indices = @transform_2, window_bounds = array<i64: 1, 1, 32>}, {transform_indices = @transform_3, window_bounds = array<i64: 1, 16, 32>}]} {
    %c0_i32 = arith.constant 0 : i32
    %0 = arith.cmpi eq, %arg3, %c0_i32 : i32
    %1 = arith.extui %0 : i1 to i32
    %c0_i32_0 = arith.constant 0 : i32
    %2 = arith.cmpi ne, %1, %c0_i32_0 : i32
    scf.if %2 {
      %cst_12 = arith.constant 0.000000e+00 : f32
      %14 = vector.broadcast %cst_12 : f32 to vector<16x32xf32>
      %c0_13 = arith.constant 0 : index
      %c0_14 = arith.constant 0 : index
      %15 = vector.load %arg8[%c0_13, %c0_14] : memref<16x32xf32, #tpu.memory_space<vmem>>, vector<16x32xf32>
      tpu.vector_store %arg8[%c0_13, %c0_14], %14 {strides = array<i32>} : memref<16x32xf32, #tpu.memory_space<vmem>>, vector<16x32xf32>,
    } else {
    }
    %c0 = arith.constant 0 : index
    %c0_1 = arith.constant 0 : index
    %3 = vector.load %arg8[%c0, %c0_1] : memref<16x32xf32, #tpu.memory_space<vmem>>, vector<16x32xf32>
    %c0_2 = arith.constant 0 : index
    %c0_3 = arith.constant 0 : index
    %c0_4 = arith.constant 0 : index
    %4 = vector.load %arg4[%c0_2, %c0_3, %c0_4] : memref<1x16x32xbf16, #tpu.memory_space<vmem>>, vector<1x16x32xbf16>
    %5 = vector.shape_cast %4 : vector<1x16x32xbf16> to vector<16x32xbf16>
    %c0_5 = arith.constant 0 : index
    %c0_6 = arith.constant 0 : index
    %c0_7 = arith.constant 0 : index
    %6 = vector.load %arg5[%c0_5, %c0_6, %c0_7] : memref<1x32x32xbf16, #tpu.memory_space<vmem>>, vector<1x32x32xbf16>
    %7 = vector.shape_cast %6 : vector<1x32x32xbf16> to vector<32x32xbf16>
    %cst = arith.constant dense<0.000000e+00> : vector<16x32xf32>
    %8 = tpu.matmul %5, %7, %cst {dimension_numbers = #tpu.dot_dimension_numbers<[1], [0], [0], [1], [0, 0, 1, 1], [], []>} : vector<16x32xbf16>, vector<32x32xbf16>, vector<16x32xf32> -> vector<16x32xf32>
    %9 = arith.addf %3, %8 : vector<16x32xf32>
    %c0_8 = arith.constant 0 : index
    %c0_9 = arith.constant 0 : index
    %10 = vector.load %arg8[%c0_8, %c0_9] : memref<16x32xf32, #tpu.memory_space<vmem>>, vector<16x32xf32>
    tpu.vector_store %arg8[%c0_8, %c0_9], %9 {strides = array<i32>} : memref<16x32xf32, #tpu.memory_space<vmem>>, vector<16x32xf32>,
    %c0_i32_10 = arith.constant 0 : i32
    %11 = arith.cmpi eq, %arg3, %c0_i32_10 : i32
    %12 = arith.extui %11 : i1 to i32
    %c0_i32_11 = arith.constant 0 : i32
    %13 = arith.cmpi ne, %12, %c0_i32_11 : i32
    scf.if %13 {
      %c0_12 = arith.constant 0 : index
      %c0_13 = arith.constant 0 : index
      %14 = vector.load %arg8[%c0_12, %c0_13] : memref<16x32xf32, #tpu.memory_space<vmem>>, vector<16x32xf32>
      %c0_14 = arith.constant 0 : index
      %c0_15 = arith.constant 0 : index
      %c0_16 = arith.constant 0 : index
      %15 = vector.load %arg6[%c0_14, %c0_15, %c0_16] : memref<1x1x32xf32, #tpu.memory_space<vmem>>, vector<1x1x32xf32>
      %16 = vector.shape_cast %15 : vector<1x1x32xf32> to vector<1x32xf32>
      %17 = vector.broadcast %16 : vector<1x32xf32> to vector<16x32xf32>
      %18 = arith.addf %14, %17 : vector<16x32xf32>
      %19 = arith.truncf %18 : vector<16x32xf32> to vector<16x32xbf16>
      %c0_17 = arith.constant 0 : index
      %c0_18 = arith.constant 0 : index
      %c0_19 = arith.constant 0 : index
      %20 = vector.load %arg7[%c0_17, %c0_18, %c0_19] : memref<1x16x32xbf16, #tpu.memory_space<vmem>>, vector<1x16x32xbf16>
      %21 = vector.shape_cast %20 : vector<1x16x32xbf16> to vector<16x32xbf16>
      %22 = vector.shape_cast %19 : vector<16x32xbf16> to vector<1x16x32xbf16>
      tpu.vector_store %arg7[%c0_17, %c0_18, %c0_19], %22 {strides = array<i32>} : memref<1x16x32xbf16, #tpu.memory_space<vmem>>, vector<1x16x32xbf16>,
    } else {
    }
    return
  }
  func.func @transform_0(%arg0: i32, %arg1: i32, %arg2: i32, %arg3: i32) -> (i32, i32, i32) {
    %c0_i32 = arith.constant 0 : i32
    return %arg0, %arg1, %arg3 : i32, i32, i32
  }
  func.func @transform_1(%arg0: i32, %arg1: i32, %arg2: i32, %arg3: i32) -> (i32, i32, i32) {
    %c0_i32 = arith.constant 0 : i32
    return %arg0, %arg3, %arg2 : i32, i32, i32
  }
  func.func @transform_2(%arg0: i32, %arg1: i32, %arg2: i32, %arg3: i32) -> (i32, i32, i32) {
    %c0_i32 = arith.constant 0 : i32
    %c0_i32_0 = arith.constant 0 : i32
    return %arg0, %c0_i32, %arg2 : i32, i32, i32
  }
  func.func @transform_3(%arg0: i32, %arg1: i32, %arg2: i32, %arg3: i32) -> (i32, i32, i32) {
    %c0_i32 = arith.constant 0 : i32
    return %arg0, %arg1, %arg2 : i32, i32, i32
  }
}

module attributes {stable_mosaic.version = 11 : i64} {
  func.func @_linear_kernel(%arg0: i32, %arg1: i32, %arg2: i32, %arg3: memref<16x32xbf16, #tpu.memory_space<vmem>>, %arg4: memref<32x32xbf16, #tpu.memory_space<vmem>>, %arg5: memref<1x32xf32, #tpu.memory_space<vmem>>, %arg6: memref<1x16x32xf32, #tpu.memory_space<vmem>>, %arg7: memref<16x32xf32, #tpu.memory_space<vmem>>) attributes {dimension_semantics = [#tpu.dimension_semantics<parallel>, #tpu.dimension_semantics<parallel>, #tpu.dimension_semantics<arbitrary>], iteration_bounds = array<i64: 1, 1, 1>, scalar_prefetch = 0 : i64, scratch_operands = 1 : i64, tpu.core_type = #tpu.core_type<tc>, window_params = [{transform_indices = @transform_0, window_bounds = array<i64: 16, 32>}, {transform_indices = @transform_1, window_bounds = array<i64: 32, 32>}, {transform_indices = @transform_2, window_bounds = array<i64: 1, 32>}, {transform_indices = @transform_3, window_bounds = array<i64: 1, 16, 32>}]} {
    %c0_i32 = arith.constant 0 : i32
    %0 = arith.cmpi eq, %arg2, %c0_i32 : i32
    %1 = arith.extui %0 : i1 to i32
    %c0_i32_0 = arith.constant 0 : i32
    %2 = arith.cmpi ne, %1, %c0_i32_0 : i32
    scf.if %2 {
      %cst_10 = arith.constant 0.000000e+00 : f32
      %12 = vector.broadcast %cst_10 : f32 to vector<16x32xf32>
      %c0_11 = arith.constant 0 : index
      %c0_12 = arith.constant 0 : index
      %13 = vector.load %arg7[%c0_11, %c0_12] : memref<16x32xf32, #tpu.memory_space<vmem>>, vector<16x32xf32>
      tpu.vector_store %arg7[%c0_11, %c0_12], %12 {strides = array<i32>} : memref<16x32xf32, #tpu.memory_space<vmem>>, vector<16x32xf32>,
    } else {
    }
    %c0 = arith.constant 0 : index
    %c0_1 = arith.constant 0 : index
    %3 = vector.load %arg7[%c0, %c0_1] : memref<16x32xf32, #tpu.memory_space<vmem>>, vector<16x32xf32>
    %c0_2 = arith.constant 0 : index
    %c0_3 = arith.constant 0 : index
    %4 = vector.load %arg3[%c0_2, %c0_3] : memref<16x32xbf16, #tpu.memory_space<vmem>>, vector<16x32xbf16>
    %c0_4 = arith.constant 0 : index
    %c0_5 = arith.constant 0 : index
    %5 = vector.load %arg4[%c0_4, %c0_5] : memref<32x32xbf16, #tpu.memory_space<vmem>>, vector<32x32xbf16>
    %cst = arith.constant dense<0.000000e+00> : vector<16x32xf32>
    %6 = tpu.matmul %4, %5, %cst {dimension_numbers = #tpu.dot_dimension_numbers<[1], [0], [0], [1], [0, 0, 1, 1], [], []>} : vector<16x32xbf16>, vector<32x32xbf16>, vector<16x32xf32> -> vector<16x32xf32>
    %7 = arith.addf %3, %6 : vector<16x32xf32>
    %c0_6 = arith.constant 0 : index
    %c0_7 = arith.constant 0 : index
    %8 = vector.load %arg7[%c0_6, %c0_7] : memref<16x32xf32, #tpu.memory_space<vmem>>, vector<16x32xf32>
    tpu.vector_store %arg7[%c0_6, %c0_7], %7 {strides = array<i32>} : memref<16x32xf32, #tpu.memory_space<vmem>>, vector<16x32xf32>,
    %c0_i32_8 = arith.constant 0 : i32
    %9 = arith.cmpi eq, %arg2, %c0_i32_8 : i32
    %10 = arith.extui %9 : i1 to i32
    %c0_i32_9 = arith.constant 0 : i32
    %11 = arith.cmpi ne, %10, %c0_i32_9 : i32
    scf.if %11 {
      %c0_10 = arith.constant 0 : index
      %c0_11 = arith.constant 0 : index
      %12 = vector.load %arg7[%c0_10, %c0_11] : memref<16x32xf32, #tpu.memory_space<vmem>>, vector<16x32xf32>
      %c0_12 = arith.constant 0 : index
      %c0_13 = arith.constant 0 : index
      %13 = vector.load %arg5[%c0_12, %c0_13] : memref<1x32xf32, #tpu.memory_space<vmem>>, vector<1x32xf32>
      %14 = vector.broadcast %13 : vector<1x32xf32> to vector<16x32xf32>
      %15 = arith.addf %12, %14 : vector<16x32xf32>
      %c0_14 = arith.constant 0 : index
      %c0_15 = arith.constant 0 : index
      %c0_16 = arith.constant 0 : index
      %16 = vector.load %arg6[%c0_14, %c0_15, %c0_16] : memref<1x16x32xf32, #tpu.memory_space<vmem>>, vector<1x16x32xf32>
      %17 = vector.shape_cast %16 : vector<1x16x32xf32> to vector<16x32xf32>
      %18 = vector.shape_cast %15 : vector<16x32xf32> to vector<1x16x32xf32>
      tpu.vector_store %arg6[%c0_14, %c0_15, %c0_16], %18 {strides = array<i32>} : memref<1x16x32xf32, #tpu.memory_space<vmem>>, vector<1x16x32xf32>,
    } else {
    }
    return
  }
  func.func @transform_0(%arg0: i32, %arg1: i32, %arg2: i32) -> (i32, i32) {
    %c0_i32 = arith.constant 0 : i32
    return %arg0, %arg2 : i32, i32
  }
  func.func @transform_1(%arg0: i32, %arg1: i32, %arg2: i32) -> (i32, i32) {
    %c0_i32 = arith.constant 0 : i32
    return %arg2, %arg1 : i32, i32
  }
  func.func @transform_2(%arg0: i32, %arg1: i32, %arg2: i32) -> (i32, i32) {
    %c0_i32 = arith.constant 0 : i32
    %c0_i32_0 = arith.constant 0 : i32
    return %c0_i32, %arg1 : i32, i32
  }
  func.func @transform_3(%arg0: i32, %arg1: i32, %arg2: i32) -> (i32, i32, i32) {
    %c0_i32 = arith.constant 0 : i32
    %c0_i32_0 = arith.constant 0 : i32
    return %arg1, %arg0, %c0_i32 : i32, i32, i32
  }
}

module attributes {stable_mosaic.version = 11 : i64} {
  func.func @_flash_mha_kernel(%arg0: i32, %arg1: i32, %arg2: i32, %arg3: memref<1x1x8x32xbf16, #tpu.memory_space<vmem>>, %arg4: memref<1x1x8x32xbf16, #tpu.memory_space<vmem>>, %arg5: memref<1x1x8x32xbf16, #tpu.memory_space<vmem>>, %arg6: memref<1x8x32xbf16, #tpu.memory_space<vmem>>, %arg7: memref<4x8x1xf32, #tpu.memory_space<vmem>>, %arg8: memref<4x8x1xf32, #tpu.memory_space<vmem>>, %arg9: memref<8x32xf32, #tpu.memory_space<vmem>>) attributes {dimension_semantics = [#tpu.dimension_semantics<parallel>, #tpu.dimension_semantics<parallel>, #tpu.dimension_semantics<arbitrary>], iteration_bounds = array<i64: 2, 1, 1>, scalar_prefetch = 0 : i64, scratch_operands = 3 : i64, tpu.core_type = #tpu.core_type<tc>, window_params = [{transform_indices = @transform_0, window_bounds = array<i64: 1, 1, 8, 32>}, {transform_indices = @transform_1, window_bounds = array<i64: 1, 1, 8, 32>}, {transform_indices = @transform_2, window_bounds = array<i64: 1, 1, 8, 32>}, {transform_indices = @transform_3, window_bounds = array<i64: 1, 8, 32>}]} {
    %c0_i32 = arith.constant 0 : i32
    %0 = arith.cmpi eq, %arg2, %c0_i32 : i32
    %1 = arith.extui %0 : i1 to i32
    %c0_i32_0 = arith.constant 0 : i32
    %2 = arith.cmpi ne, %1, %c0_i32_0 : i32
    scf.if %2 {
      %cst_87 = arith.constant 0xFF800000 : f32
      %144 = vector.broadcast %cst_87 : f32 to vector<4x8x1xf32>
      %c0_88 = arith.constant 0 : index
      %c0_89 = arith.constant 0 : index
      %c0_90 = arith.constant 0 : index
      %145 = vector.load %arg7[%c0_88, %c0_89, %c0_90] : memref<4x8x1xf32, #tpu.memory_space<vmem>>, vector<4x8x1xf32>
      tpu.vector_store %arg7[%c0_88, %c0_89, %c0_90], %144 {strides = array<i32>} : memref<4x8x1xf32, #tpu.memory_space<vmem>>, vector<4x8x1xf32>,
      %cst_91 = arith.constant 0.000000e+00 : f32
      %146 = vector.broadcast %cst_91 : f32 to vector<4x8x1xf32>
      %c0_92 = arith.constant 0 : index
      %c0_93 = arith.constant 0 : index
      %c0_94 = arith.constant 0 : index
      %147 = vector.load %arg8[%c0_92, %c0_93, %c0_94] : memref<4x8x1xf32, #tpu.memory_space<vmem>>, vector<4x8x1xf32>
      tpu.vector_store %arg8[%c0_92, %c0_93, %c0_94], %146 {strides = array<i32>} : memref<4x8x1xf32, #tpu.memory_space<vmem>>, vector<4x8x1xf32>,
      %cst_95 = arith.constant 0.000000e+00 : f32
      %148 = vector.broadcast %cst_95 : f32 to vector<8x32xf32>
      %c0_96 = arith.constant 0 : index
      %c0_97 = arith.constant 0 : index
      %149 = vector.load %arg9[%c0_96, %c0_97] : memref<8x32xf32, #tpu.memory_space<vmem>>, vector<8x32xf32>
      tpu.vector_store %arg9[%c0_96, %c0_97], %148 {strides = array<i32>} : memref<8x32xf32, #tpu.memory_space<vmem>>, vector<8x32xf32>,
    } else {
    }
    %c0 = arith.constant 0 : index
    %c0_1 = arith.constant 0 : index
    %c0_2 = arith.constant 0 : index
    %c0_3 = arith.constant 0 : index
    %3 = vector.load %arg3[%c0, %c0_1, %c0_2, %c0_3] : memref<1x1x8x32xbf16, #tpu.memory_space<vmem>>, vector<1x1x8x32xbf16>
    %4 = vector.shape_cast %3 : vector<1x1x8x32xbf16> to vector<8x32xbf16>
    %c0_4 = arith.constant 0 : index
    %c0_5 = arith.constant 0 : index
    %c0_6 = arith.constant 0 : index
    %c0_7 = arith.constant 0 : index
    %5 = vector.load %arg4[%c0_4, %c0_5, %c0_6, %c0_7] : memref<1x1x8x32xbf16, #tpu.memory_space<vmem>>, vector<1x1x8x32xbf16>
    %6 = vector.shape_cast %5 : vector<1x1x8x32xbf16> to vector<8x32xbf16>
    %c0_8 = arith.constant 0 : index
    %c0_9 = arith.constant 0 : index
    %c0_10 = arith.constant 0 : index
    %c0_11 = arith.constant 0 : index
    %7 = vector.load %arg5[%c0_8, %c0_9, %c0_10, %c0_11] : memref<1x1x8x32xbf16, #tpu.memory_space<vmem>>, vector<1x1x8x32xbf16>
    %8 = vector.shape_cast %7 : vector<1x1x8x32xbf16> to vector<8x32xbf16>
    %9 = vector.extract_strided_slice %4 {offsets = [0, 0], sizes = [8, 8], strides = [1, 1]} : vector<8x32xbf16> to vector<8x8xbf16>
    %10 = vector.extract_strided_slice %6 {offsets = [0, 0], sizes = [8, 8], strides = [1, 1]} : vector<8x32xbf16> to vector<8x8xbf16>
    %cst = arith.constant dense<0.000000e+00> : vector<8x8xf32>
    %11 = tpu.matmul %9, %10, %cst {dimension_numbers = #tpu.dot_dimension_numbers<[1], [1], [0], [0], [0, 0, 1, 0], [], []>} : vector<8x8xbf16>, vector<8x8xbf16>, vector<8x8xf32> -> vector<8x8xf32>
    %c0_12 = arith.constant 0 : index
    %c0_13 = arith.constant 0 : index
    %c0_14 = arith.constant 0 : index
    %12 = vector.load %arg7[%c0_12, %c0_13, %c0_14] : memref<4x8x1xf32, #tpu.memory_space<vmem>>, vector<1x8x1xf32>
    %13 = vector.shape_cast %12 : vector<1x8x1xf32> to vector<8x1xf32>
    %cst_15 = arith.constant dense<0xFF800000> : vector<8xf32>
    %14 = vector.multi_reduction <maximumf>, %11, %cst_15 [1] : vector<8x8xf32> to vector<8xf32>
    %15 = vector.shape_cast %14 : vector<8xf32> to vector<8x1xf32>
    %16 = arith.maximumf %13, %15 : vector<8x1xf32>
    %17 = arith.subf %13, %16 : vector<8x1xf32>
    %18 = math.exp %17 : vector<8x1xf32>
    %19 = vector.broadcast %16 : vector<8x1xf32> to vector<8x8xf32>
    %20 = arith.subf %11, %19 : vector<8x8xf32>
    %21 = math.exp %20 : vector<8x8xf32>
    %c0_16 = arith.constant 0 : index
    %c0_17 = arith.constant 0 : index
    %c0_18 = arith.constant 0 : index
    %22 = vector.load %arg8[%c0_16, %c0_17, %c0_18] : memref<4x8x1xf32, #tpu.memory_space<vmem>>, vector<1x8x1xf32>
    %23 = vector.shape_cast %22 : vector<1x8x1xf32> to vector<8x1xf32>
    %24 = arith.mulf %18, %23 : vector<8x1xf32>
    %cst_19 = arith.constant dense<0.000000e+00> : vector<8xf32>
    %25 = vector.multi_reduction <add>, %21, %cst_19 [1] : vector<8x8xf32> to vector<8xf32>
    %26 = vector.shape_cast %25 : vector<8xf32> to vector<8x1xf32>
    %27 = arith.addf %24, %26 : vector<8x1xf32>
    %c0_20 = arith.constant 0 : index
    %c0_21 = arith.constant 0 : index
    %c0_22 = arith.constant 0 : index
    %28 = vector.load %arg8[%c0_20, %c0_21, %c0_22] : memref<4x8x1xf32, #tpu.memory_space<vmem>>, vector<1x8x1xf32>
    %29 = vector.shape_cast %28 : vector<1x8x1xf32> to vector<8x1xf32>
    %30 = vector.shape_cast %27 : vector<8x1xf32> to vector<1x8x1xf32>
    tpu.vector_store %arg8[%c0_20, %c0_21, %c0_22], %30 {strides = array<i32>} : memref<4x8x1xf32, #tpu.memory_space<vmem>>, vector<1x8x1xf32>,
    %31 = arith.truncf %21 : vector<8x8xf32> to vector<8x8xbf16>
    %32 = vector.extract_strided_slice %8 {offsets = [0, 0], sizes = [8, 8], strides = [1, 1]} : vector<8x32xbf16> to vector<8x8xbf16>
    %cst_23 = arith.constant dense<0.000000e+00> : vector<8x8xf32>
    %33 = tpu.matmul %31, %32, %cst_23 {dimension_numbers = #tpu.dot_dimension_numbers<[1], [0], [0], [1], [0, 0, 1, 1], [], []>} : vector<8x8xbf16>, vector<8x8xbf16>, vector<8x8xf32> -> vector<8x8xf32>
    %c0_24 = arith.constant 0 : index
    %c0_25 = arith.constant 0 : index
    %34 = vector.load %arg9[%c0_24, %c0_25] : memref<8x32xf32, #tpu.memory_space<vmem>>, vector<8x8xf32>
    %35 = vector.broadcast %18 : vector<8x1xf32> to vector<8x8xf32>
    %36 = arith.mulf %35, %34 : vector<8x8xf32>
    %37 = arith.addf %36, %33 : vector<8x8xf32>
    %c0_26 = arith.constant 0 : index
    %c0_27 = arith.constant 0 : index
    %38 = vector.load %arg9[%c0_26, %c0_27] : memref<8x32xf32, #tpu.memory_space<vmem>>, vector<8x8xf32>
    tpu.vector_store %arg9[%c0_26, %c0_27], %37 {strides = array<i32>} : memref<8x32xf32, #tpu.memory_space<vmem>>, vector<8x8xf32>,
    %c0_28 = arith.constant 0 : index
    %c0_29 = arith.constant 0 : index
    %c0_30 = arith.constant 0 : index
    %39 = vector.load %arg7[%c0_28, %c0_29, %c0_30] : memref<4x8x1xf32, #tpu.memory_space<vmem>>, vector<1x8x1xf32>
    %40 = vector.shape_cast %39 : vector<1x8x1xf32> to vector<8x1xf32>
    %41 = vector.shape_cast %16 : vector<8x1xf32> to vector<1x8x1xf32>
    tpu.vector_store %arg7[%c0_28, %c0_29, %c0_30], %41 {strides = array<i32>} : memref<4x8x1xf32, #tpu.memory_space<vmem>>, vector<1x8x1xf32>,
    %42 = vector.extract_strided_slice %4 {offsets = [0, 8], sizes = [8, 8], strides = [1, 1]} : vector<8x32xbf16> to vector<8x8xbf16>
    %43 = vector.extract_strided_slice %6 {offsets = [0, 8], sizes = [8, 8], strides = [1, 1]} : vector<8x32xbf16> to vector<8x8xbf16>
    %cst_31 = arith.constant dense<0.000000e+00> : vector<8x8xf32>
    %44 = tpu.matmul %42, %43, %cst_31 {dimension_numbers = #tpu.dot_dimension_numbers<[1], [1], [0], [0], [0, 0, 1, 0], [], []>} : vector<8x8xbf16>, vector<8x8xbf16>, vector<8x8xf32> -> vector<8x8xf32>
    %c1 = arith.constant 1 : index
    %c0_32 = arith.constant 0 : index
    %c0_33 = arith.constant 0 : index
    %45 = vector.load %arg7[%c1, %c0_32, %c0_33] : memref<4x8x1xf32, #tpu.memory_space<vmem>>, vector<1x8x1xf32>
    %46 = vector.shape_cast %45 : vector<1x8x1xf32> to vector<8x1xf32>
    %cst_34 = arith.constant dense<0xFF800000> : vector<8xf32>
    %47 = vector.multi_reduction <maximumf>, %44, %cst_34 [1] : vector<8x8xf32> to vector<8xf32>
    %48 = vector.shape_cast %47 : vector<8xf32> to vector<8x1xf32>
    %49 = arith.maximumf %46, %48 : vector<8x1xf32>
    %50 = arith.subf %46, %49 : vector<8x1xf32>
    %51 = math.exp %50 : vector<8x1xf32>
    %52 = vector.broadcast %49 : vector<8x1xf32> to vector<8x8xf32>
    %53 = arith.subf %44, %52 : vector<8x8xf32>
    %54 = math.exp %53 : vector<8x8xf32>
    %c1_35 = arith.constant 1 : index
    %c0_36 = arith.constant 0 : index
    %c0_37 = arith.constant 0 : index
    %55 = vector.load %arg8[%c1_35, %c0_36, %c0_37] : memref<4x8x1xf32, #tpu.memory_space<vmem>>, vector<1x8x1xf32>
    %56 = vector.shape_cast %55 : vector<1x8x1xf32> to vector<8x1xf32>
    %57 = arith.mulf %51, %56 : vector<8x1xf32>
    %cst_38 = arith.constant dense<0.000000e+00> : vector<8xf32>
    %58 = vector.multi_reduction <add>, %54, %cst_38 [1] : vector<8x8xf32> to vector<8xf32>
    %59 = vector.shape_cast %58 : vector<8xf32> to vector<8x1xf32>
    %60 = arith.addf %57, %59 : vector<8x1xf32>
    %c1_39 = arith.constant 1 : index
    %c0_40 = arith.constant 0 : index
    %c0_41 = arith.constant 0 : index
    %61 = vector.load %arg8[%c1_39, %c0_40, %c0_41] : memref<4x8x1xf32, #tpu.memory_space<vmem>>, vector<1x8x1xf32>
    %62 = vector.shape_cast %61 : vector<1x8x1xf32> to vector<8x1xf32>
    %63 = vector.shape_cast %60 : vector<8x1xf32> to vector<1x8x1xf32>
    tpu.vector_store %arg8[%c1_39, %c0_40, %c0_41], %63 {strides = array<i32>} : memref<4x8x1xf32, #tpu.memory_space<vmem>>, vector<1x8x1xf32>,
    %64 = arith.truncf %54 : vector<8x8xf32> to vector<8x8xbf16>
    %65 = vector.extract_strided_slice %8 {offsets = [0, 8], sizes = [8, 8], strides = [1, 1]} : vector<8x32xbf16> to vector<8x8xbf16>
    %cst_42 = arith.constant dense<0.000000e+00> : vector<8x8xf32>
    %66 = tpu.matmul %64, %65, %cst_42 {dimension_numbers = #tpu.dot_dimension_numbers<[1], [0], [0], [1], [0, 0, 1, 1], [], []>} : vector<8x8xbf16>, vector<8x8xbf16>, vector<8x8xf32> -> vector<8x8xf32>
    %c0_43 = arith.constant 0 : index
    %c8 = arith.constant 8 : index
    %67 = vector.load %arg9[%c0_43, %c8] : memref<8x32xf32, #tpu.memory_space<vmem>>, vector<8x8xf32>
    %68 = vector.broadcast %51 : vector<8x1xf32> to vector<8x8xf32>
    %69 = arith.mulf %68, %67 : vector<8x8xf32>
    %70 = arith.addf %69, %66 : vector<8x8xf32>
    %c0_44 = arith.constant 0 : index
    %c8_45 = arith.constant 8 : index
    %71 = vector.load %arg9[%c0_44, %c8_45] : memref<8x32xf32, #tpu.memory_space<vmem>>, vector<8x8xf32>
    tpu.vector_store %arg9[%c0_44, %c8_45], %70 {strides = array<i32>} : memref<8x32xf32, #tpu.memory_space<vmem>>, vector<8x8xf32>,
    %c1_46 = arith.constant 1 : index
    %c0_47 = arith.constant 0 : index
    %c0_48 = arith.constant 0 : index
    %72 = vector.load %arg7[%c1_46, %c0_47, %c0_48] : memref<4x8x1xf32, #tpu.memory_space<vmem>>, vector<1x8x1xf32>
    %73 = vector.shape_cast %72 : vector<1x8x1xf32> to vector<8x1xf32>
    %74 = vector.shape_cast %49 : vector<8x1xf32> to vector<1x8x1xf32>
    tpu.vector_store %arg7[%c1_46, %c0_47, %c0_48], %74 {strides = array<i32>} : memref<4x8x1xf32, #tpu.memory_space<vmem>>, vector<1x8x1xf32>,
    %75 = vector.extract_strided_slice %4 {offsets = [0, 16], sizes = [8, 8], strides = [1, 1]} : vector<8x32xbf16> to vector<8x8xbf16>
    %76 = vector.extract_strided_slice %6 {offsets = [0, 16], sizes = [8, 8], strides = [1, 1]} : vector<8x32xbf16> to vector<8x8xbf16>
    %cst_49 = arith.constant dense<0.000000e+00> : vector<8x8xf32>
    %77 = tpu.matmul %75, %76, %cst_49 {dimension_numbers = #tpu.dot_dimension_numbers<[1], [1], [0], [0], [0, 0, 1, 0], [], []>} : vector<8x8xbf16>, vector<8x8xbf16>, vector<8x8xf32> -> vector<8x8xf32>
    %c2 = arith.constant 2 : index
    %c0_50 = arith.constant 0 : index
    %c0_51 = arith.constant 0 : index
    %78 = vector.load %arg7[%c2, %c0_50, %c0_51] : memref<4x8x1xf32, #tpu.memory_space<vmem>>, vector<1x8x1xf32>
    %79 = vector.shape_cast %78 : vector<1x8x1xf32> to vector<8x1xf32>
    %cst_52 = arith.constant dense<0xFF800000> : vector<8xf32>
    %80 = vector.multi_reduction <maximumf>, %77, %cst_52 [1] : vector<8x8xf32> to vector<8xf32>
    %81 = vector.shape_cast %80 : vector<8xf32> to vector<8x1xf32>
    %82 = arith.maximumf %79, %81 : vector<8x1xf32>
    %83 = arith.subf %79, %82 : vector<8x1xf32>
    %84 = math.exp %83 : vector<8x1xf32>
    %85 = vector.broadcast %82 : vector<8x1xf32> to vector<8x8xf32>
    %86 = arith.subf %77, %85 : vector<8x8xf32>
    %87 = math.exp %86 : vector<8x8xf32>
    %c2_53 = arith.constant 2 : index
    %c0_54 = arith.constant 0 : index
    %c0_55 = arith.constant 0 : index
    %88 = vector.load %arg8[%c2_53, %c0_54, %c0_55] : memref<4x8x1xf32, #tpu.memory_space<vmem>>, vector<1x8x1xf32>
    %89 = vector.shape_cast %88 : vector<1x8x1xf32> to vector<8x1xf32>
    %90 = arith.mulf %84, %89 : vector<8x1xf32>
    %cst_56 = arith.constant dense<0.000000e+00> : vector<8xf32>
    %91 = vector.multi_reduction <add>, %87, %cst_56 [1] : vector<8x8xf32> to vector<8xf32>
    %92 = vector.shape_cast %91 : vector<8xf32> to vector<8x1xf32>
    %93 = arith.addf %90, %92 : vector<8x1xf32>
    %c2_57 = arith.constant 2 : index
    %c0_58 = arith.constant 0 : index
    %c0_59 = arith.constant 0 : index
    %94 = vector.load %arg8[%c2_57, %c0_58, %c0_59] : memref<4x8x1xf32, #tpu.memory_space<vmem>>, vector<1x8x1xf32>
    %95 = vector.shape_cast %94 : vector<1x8x1xf32> to vector<8x1xf32>
    %96 = vector.shape_cast %93 : vector<8x1xf32> to vector<1x8x1xf32>
    tpu.vector_store %arg8[%c2_57, %c0_58, %c0_59], %96 {strides = array<i32>} : memref<4x8x1xf32, #tpu.memory_space<vmem>>, vector<1x8x1xf32>,
    %97 = arith.truncf %87 : vector<8x8xf32> to vector<8x8xbf16>
    %98 = vector.extract_strided_slice %8 {offsets = [0, 16], sizes = [8, 8], strides = [1, 1]} : vector<8x32xbf16> to vector<8x8xbf16>
    %cst_60 = arith.constant dense<0.000000e+00> : vector<8x8xf32>
    %99 = tpu.matmul %97, %98, %cst_60 {dimension_numbers = #tpu.dot_dimension_numbers<[1], [0], [0], [1], [0, 0, 1, 1], [], []>} : vector<8x8xbf16>, vector<8x8xbf16>, vector<8x8xf32> -> vector<8x8xf32>
    %c0_61 = arith.constant 0 : index
    %c16 = arith.constant 16 : index
    %100 = vector.load %arg9[%c0_61, %c16] : memref<8x32xf32, #tpu.memory_space<vmem>>, vector<8x8xf32>
    %101 = vector.broadcast %84 : vector<8x1xf32> to vector<8x8xf32>
    %102 = arith.mulf %101, %100 : vector<8x8xf32>
    %103 = arith.addf %102, %99 : vector<8x8xf32>
    %c0_62 = arith.constant 0 : index
    %c16_63 = arith.constant 16 : index
    %104 = vector.load %arg9[%c0_62, %c16_63] : memref<8x32xf32, #tpu.memory_space<vmem>>, vector<8x8xf32>
    tpu.vector_store %arg9[%c0_62, %c16_63], %103 {strides = array<i32>} : memref<8x32xf32, #tpu.memory_space<vmem>>, vector<8x8xf32>,
    %c2_64 = arith.constant 2 : index
    %c0_65 = arith.constant 0 : index
    %c0_66 = arith.constant 0 : index
    %105 = vector.load %arg7[%c2_64, %c0_65, %c0_66] : memref<4x8x1xf32, #tpu.memory_space<vmem>>, vector<1x8x1xf32>
    %106 = vector.shape_cast %105 : vector<1x8x1xf32> to vector<8x1xf32>
    %107 = vector.shape_cast %82 : vector<8x1xf32> to vector<1x8x1xf32>
    tpu.vector_store %arg7[%c2_64, %c0_65, %c0_66], %107 {strides = array<i32>} : memref<4x8x1xf32, #tpu.memory_space<vmem>>, vector<1x8x1xf32>,
    %108 = vector.extract_strided_slice %4 {offsets = [0, 24], sizes = [8, 8], strides = [1, 1]} : vector<8x32xbf16> to vector<8x8xbf16>
    %109 = vector.extract_strided_slice %6 {offsets = [0, 24], sizes = [8, 8], strides = [1, 1]} : vector<8x32xbf16> to vector<8x8xbf16>
    %cst_67 = arith.constant dense<0.000000e+00> : vector<8x8xf32>
    %110 = tpu.matmul %108, %109, %cst_67 {dimension_numbers = #tpu.dot_dimension_numbers<[1], [1], [0], [0], [0, 0, 1, 0], [], []>} : vector<8x8xbf16>, vector<8x8xbf16>, vector<8x8xf32> -> vector<8x8xf32>
    %c3 = arith.constant 3 : index
    %c0_68 = arith.constant 0 : index
    %c0_69 = arith.constant 0 : index
    %111 = vector.load %arg7[%c3, %c0_68, %c0_69] : memref<4x8x1xf32, #tpu.memory_space<vmem>>, vector<1x8x1xf32>
    %112 = vector.shape_cast %111 : vector<1x8x1xf32> to vector<8x1xf32>
    %cst_70 = arith.constant dense<0xFF800000> : vector<8xf32>
    %113 = vector.multi_reduction <maximumf>, %110, %cst_70 [1] : vector<8x8xf32> to vector<8xf32>
    %114 = vector.shape_cast %113 : vector<8xf32> to vector<8x1xf32>
    %115 = arith.maximumf %112, %114 : vector<8x1xf32>
    %116 = arith.subf %112, %115 : vector<8x1xf32>
    %117 = math.exp %116 : vector<8x1xf32>
    %118 = vector.broadcast %115 : vector<8x1xf32> to vector<8x8xf32>
    %119 = arith.subf %110, %118 : vector<8x8xf32>
    %120 = math.exp %119 : vector<8x8xf32>
    %c3_71 = arith.constant 3 : index
    %c0_72 = arith.constant 0 : index
    %c0_73 = arith.constant 0 : index
    %121 = vector.load %arg8[%c3_71, %c0_72, %c0_73] : memref<4x8x1xf32, #tpu.memory_space<vmem>>, vector<1x8x1xf32>
    %122 = vector.shape_cast %121 : vector<1x8x1xf32> to vector<8x1xf32>
    %123 = arith.mulf %117, %122 : vector<8x1xf32>
    %cst_74 = arith.constant dense<0.000000e+00> : vector<8xf32>
    %124 = vector.multi_reduction <add>, %120, %cst_74 [1] : vector<8x8xf32> to vector<8xf32>
    %125 = vector.shape_cast %124 : vector<8xf32> to vector<8x1xf32>
    %126 = arith.addf %123, %125 : vector<8x1xf32>
    %c3_75 = arith.constant 3 : index
    %c0_76 = arith.constant 0 : index
    %c0_77 = arith.constant 0 : index
    %127 = vector.load %arg8[%c3_75, %c0_76, %c0_77] : memref<4x8x1xf32, #tpu.memory_space<vmem>>, vector<1x8x1xf32>
    %128 = vector.shape_cast %127 : vector<1x8x1xf32> to vector<8x1xf32>
    %129 = vector.shape_cast %126 : vector<8x1xf32> to vector<1x8x1xf32>
    tpu.vector_store %arg8[%c3_75, %c0_76, %c0_77], %129 {strides = array<i32>} : memref<4x8x1xf32, #tpu.memory_space<vmem>>, vector<1x8x1xf32>,
    %130 = arith.truncf %120 : vector<8x8xf32> to vector<8x8xbf16>
    %131 = vector.extract_strided_slice %8 {offsets = [0, 24], sizes = [8, 8], strides = [1, 1]} : vector<8x32xbf16> to vector<8x8xbf16>
    %cst_78 = arith.constant dense<0.000000e+00> : vector<8x8xf32>
    %132 = tpu.matmul %130, %131, %cst_78 {dimension_numbers = #tpu.dot_dimension_numbers<[1], [0], [0], [1], [0, 0, 1, 1], [], []>} : vector<8x8xbf16>, vector<8x8xbf16>, vector<8x8xf32> -> vector<8x8xf32>
    %c0_79 = arith.constant 0 : index
    %c24 = arith.constant 24 : index
    %133 = vector.load %arg9[%c0_79, %c24] : memref<8x32xf32, #tpu.memory_space<vmem>>, vector<8x8xf32>
    %134 = vector.broadcast %117 : vector<8x1xf32> to vector<8x8xf32>
    %135 = arith.mulf %134, %133 : vector<8x8xf32>
    %136 = arith.addf %135, %132 : vector<8x8xf32>
    %c0_80 = arith.constant 0 : index
    %c24_81 = arith.constant 24 : index
    %137 = vector.load %arg9[%c0_80, %c24_81] : memref<8x32xf32, #tpu.memory_space<vmem>>, vector<8x8xf32>
    tpu.vector_store %arg9[%c0_80, %c24_81], %136 {strides = array<i32>} : memref<8x32xf32, #tpu.memory_space<vmem>>, vector<8x8xf32>,
    %c3_82 = arith.constant 3 : index
    %c0_83 = arith.constant 0 : index
    %c0_84 = arith.constant 0 : index
    %138 = vector.load %arg7[%c3_82, %c0_83, %c0_84] : memref<4x8x1xf32, #tpu.memory_space<vmem>>, vector<1x8x1xf32>
    %139 = vector.shape_cast %138 : vector<1x8x1xf32> to vector<8x1xf32>
    %140 = vector.shape_cast %115 : vector<8x1xf32> to vector<1x8x1xf32>
    tpu.vector_store %arg7[%c3_82, %c0_83, %c0_84], %140 {strides = array<i32>} : memref<4x8x1xf32, #tpu.memory_space<vmem>>, vector<1x8x1xf32>,
    %c0_i32_85 = arith.constant 0 : i32
    %141 = arith.cmpi eq, %arg2, %c0_i32_85 : i32
    %142 = arith.extui %141 : i1 to i32
    %c0_i32_86 = arith.constant 0 : i32
    %143 = arith.cmpi ne, %142, %c0_i32_86 : i32
    scf.if %143 {
      %c0_87 = arith.constant 0 : index
      %c0_88 = arith.constant 0 : index
      %144 = vector.load %arg9[%c0_87, %c0_88] : memref<8x32xf32, #tpu.memory_space<vmem>>, vector<8x8xf32>
      %c0_89 = arith.constant 0 : index
      %c0_90 = arith.constant 0 : index
      %c0_91 = arith.constant 0 : index
      %145 = vector.load %arg8[%c0_89, %c0_90, %c0_91] : memref<4x8x1xf32, #tpu.memory_space<vmem>>, vector<1x8x1xf32>
      %146 = vector.shape_cast %145 : vector<1x8x1xf32> to vector<8x1xf32>
      %147 = tpu.reciprocal %146 {approx = true} : vector<8x1xf32> -> vector<8x1xf32>
      %148 = vector.broadcast %147 : vector<8x1xf32> to vector<8x8xf32>
      %149 = arith.mulf %144, %148 : vector<8x8xf32>
      %c0_92 = arith.constant 0 : index
      %c0_93 = arith.constant 0 : index
      %150 = vector.load %arg9[%c0_92, %c0_93] : memref<8x32xf32, #tpu.memory_space<vmem>>, vector<8x8xf32>
      tpu.vector_store %arg9[%c0_92, %c0_93], %149 {strides = array<i32>} : memref<8x32xf32, #tpu.memory_space<vmem>>, vector<8x8xf32>,
      %c0_94 = arith.constant 0 : index
      %c8_95 = arith.constant 8 : index
      %151 = vector.load %arg9[%c0_94, %c8_95] : memref<8x32xf32, #tpu.memory_space<vmem>>, vector<8x8xf32>
      %c1_96 = arith.constant 1 : index
      %c0_97 = arith.constant 0 : index
      %c0_98 = arith.constant 0 : index
      %152 = vector.load %arg8[%c1_96, %c0_97, %c0_98] : memref<4x8x1xf32, #tpu.memory_space<vmem>>, vector<1x8x1xf32>
      %153 = vector.shape_cast %152 : vector<1x8x1xf32> to vector<8x1xf32>
      %154 = tpu.reciprocal %153 {approx = true} : vector<8x1xf32> -> vector<8x1xf32>
      %155 = vector.broadcast %154 : vector<8x1xf32> to vector<8x8xf32>
      %156 = arith.mulf %151, %155 : vector<8x8xf32>
      %c0_99 = arith.constant 0 : index
      %c8_100 = arith.constant 8 : index
      %157 = vector.load %arg9[%c0_99, %c8_100] : memref<8x32xf32, #tpu.memory_space<vmem>>, vector<8x8xf32>
      tpu.vector_store %arg9[%c0_99, %c8_100], %156 {strides = array<i32>} : memref<8x32xf32, #tpu.memory_space<vmem>>, vector<8x8xf32>,
      %c0_101 = arith.constant 0 : index
      %c16_102 = arith.constant 16 : index
      %158 = vector.load %arg9[%c0_101, %c16_102] : memref<8x32xf32, #tpu.memory_space<vmem>>, vector<8x8xf32>
      %c2_103 = arith.constant 2 : index
      %c0_104 = arith.constant 0 : index
      %c0_105 = arith.constant 0 : index
      %159 = vector.load %arg8[%c2_103, %c0_104, %c0_105] : memref<4x8x1xf32, #tpu.memory_space<vmem>>, vector<1x8x1xf32>
      %160 = vector.shape_cast %159 : vector<1x8x1xf32> to vector<8x1xf32>
      %161 = tpu.reciprocal %160 {approx = true} : vector<8x1xf32> -> vector<8x1xf32>
      %162 = vector.broadcast %161 : vector<8x1xf32> to vector<8x8xf32>
      %163 = arith.mulf %158, %162 : vector<8x8xf32>
      %c0_106 = arith.constant 0 : index
      %c16_107 = arith.constant 16 : index
      %164 = vector.load %arg9[%c0_106, %c16_107] : memref<8x32xf32, #tpu.memory_space<vmem>>, vector<8x8xf32>
      tpu.vector_store %arg9[%c0_106, %c16_107], %163 {strides = array<i32>} : memref<8x32xf32, #tpu.memory_space<vmem>>, vector<8x8xf32>,
      %c0_108 = arith.constant 0 : index
      %c24_109 = arith.constant 24 : index
      %165 = vector.load %arg9[%c0_108, %c24_109] : memref<8x32xf32, #tpu.memory_space<vmem>>, vector<8x8xf32>
      %c3_110 = arith.constant 3 : index
      %c0_111 = arith.constant 0 : index
      %c0_112 = arith.constant 0 : index
      %166 = vector.load %arg8[%c3_110, %c0_111, %c0_112] : memref<4x8x1xf32, #tpu.memory_space<vmem>>, vector<1x8x1xf32>
      %167 = vector.shape_cast %166 : vector<1x8x1xf32> to vector<8x1xf32>
      %168 = tpu.reciprocal %167 {approx = true} : vector<8x1xf32> -> vector<8x1xf32>
      %169 = vector.broadcast %168 : vector<8x1xf32> to vector<8x8xf32>
      %170 = arith.mulf %165, %169 : vector<8x8xf32>
      %c0_113 = arith.constant 0 : index
      %c24_114 = arith.constant 24 : index
      %171 = vector.load %arg9[%c0_113, %c24_114] : memref<8x32xf32, #tpu.memory_space<vmem>>, vector<8x8xf32>
      tpu.vector_store %arg9[%c0_113, %c24_114], %170 {strides = array<i32>} : memref<8x32xf32, #tpu.memory_space<vmem>>, vector<8x8xf32>,
      %c0_115 = arith.constant 0 : index
      %c0_116 = arith.constant 0 : index
      %172 = vector.load %arg9[%c0_115, %c0_116] : memref<8x32xf32, #tpu.memory_space<vmem>>, vector<8x32xf32>
      %173 = arith.truncf %172 : vector<8x32xf32> to vector<8x32xbf16>
      %c0_117 = arith.constant 0 : index
      %c0_118 = arith.constant 0 : index
      %c0_119 = arith.constant 0 : index
      %174 = vector.load %arg6[%c0_117, %c0_118, %c0_119] : memref<1x8x32xbf16, #tpu.memory_space<vmem>>, vector<1x8x32xbf16>
      %175 = vector.shape_cast %174 : vector<1x8x32xbf16> to vector<8x32xbf16>
      %176 = vector.shape_cast %173 : vector<8x32xbf16> to vector<1x8x32xbf16>
      tpu.vector_store %arg6[%c0_117, %c0_118, %c0_119], %176 {strides = array<i32>} : memref<1x8x32xbf16, #tpu.memory_space<vmem>>, vector<1x8x32xbf16>,
    } else {
    }
    return
  }
  func.func @transform_0(%arg0: i32, %arg1: i32, %arg2: i32) -> (i32, i32, i32, i32) {
    %c0_i32 = arith.constant 0 : i32
    %c0_i32_0 = arith.constant 0 : i32
    %c0_i32_1 = arith.constant 0 : i32
    return %c0_i32, %arg0, %arg1, %c0_i32_0 : i32, i32, i32, i32
  }
  func.func @transform_1(%arg0: i32, %arg1: i32, %arg2: i32) -> (i32, i32, i32, i32) {
    %c1_i32 = arith.constant 1 : i32
    %c0_i32 = arith.constant 0 : i32
    %c0_i32_0 = arith.constant 0 : i32
    return %c1_i32, %arg0, %arg2, %c0_i32 : i32, i32, i32, i32
  }
  func.func @transform_2(%arg0: i32, %arg1: i32, %arg2: i32) -> (i32, i32, i32, i32) {
    %c2_i32 = arith.constant 2 : i32
    %c0_i32 = arith.constant 0 : i32
    %c0_i32_0 = arith.constant 0 : i32
    return %c2_i32, %arg0, %arg2, %c0_i32 : i32, i32, i32, i32
  }
  func.func @transform_3(%arg0: i32, %arg1: i32, %arg2: i32) -> (i32, i32, i32) {
    %c0_i32 = arith.constant 0 : i32
    %c0_i32_0 = arith.constant 0 : i32
    return %arg0, %arg1, %c0_i32 : i32, i32, i32
  }
}

</mosaic_0001>

<bundles_post_ra>
// kernel: _forward_cross.3
= control target key start
LH: loop header
LB: loop body
LE: loop exit
PB: predicated region body
PF: predicated region fallthrough
CT: control target
= control target key end

     0   :  { %s672_s12 = smov 0   ;;  %s674_s13 = smov 0   ;;  %s716_s0 = inlined_call_operand.vmem [shape: bf16[3,16,32], index: 0, kind: input, shape index: {}]   ;;  %s717_s1 = inlined_call_operand.vmem [shape: bf16[3,32,32], index: 1, kind: input, shape index: {}]   ;;  %s718_s2 = inlined_call_operand.vmem [shape: f32[3,1,32], index: 2, kind: input, shape index: {}]   ;;  %s719_s3 = inlined_call_operand.vmem [shape: bf16[3,16,32], index: 3, kind: output, shape index: {}]  }
   0x1   :  { %s676_s14 = smov 0  }
   0x2 LB: > { %s39_s15 = sadd.s32 1, %s644_s13  ;;  %p565_p0 = scmp.ge.s32.totalorder %s648_s14, 1  ;;  %s648_s14 = sphi %s676_s14, %s13_s14   ;;  %s644_s13 = sphi %s674_s13, %s721_s13   ;;  %s640_s12 = sphi %s672_s12, %s720_s12  }
   0x3   : > { %p41_p1 = scmp.ge.s32.totalorder %s39_s15, 3  ;;  %p214_p2 = scmp.lt.s32.totalorder %s648_s14, 4 }
   0x5   : > { %s723_s15 = smov (%p41_p1, %s39_s15), 0  ;;  %p215_p3 = pnand %p565_p0, %p214_p2 }
   0x6   : > { %p271_p4 = scmp.lt.s32.totalorder (!%p215_p3), %s640_s12, 2 }
   0x7   : > { %218 = sbr.rel (%p215_p3) target bundleno = 235 (0xeb), region = 32 }
   0xc   : > { %vm320_vm0 = vcmask 261120   ;;  %v650_v0 = vmov 0.0   ;;  %vm651_vm1 = vmmov 0   ;;  %s725_s12 = smov (!%p271_p4, %s640_s12), 2  ;;  %vm419_vm2 = vcmask 257024  }
   0xd   : > { %589 = vmatprep.subr.bf16.mxu0 %v650_v0  ;;  %593 = vmatprep.mubr.msk.bf16.mxu0 %vm651_vm1, %v650_v0  ;;  %321 = vst.msk [vmem:[#allocation2] sm:$0xff] %vm320_vm0, %v650_v0  ;;  %322 = vst.msk [vmem:[#allocation2 + $0x8] sm:$0xff] %vm320_vm0, %v650_v0  ;;  %s582_s16 = sshll.u32 %s725_s12, 4  ;;  %s581_s20 = sshll.u32 %s725_s12, 3 }
   0xe   : > { %s294_s19 = scalar_lea.vmem %s717_s1, %s582_s16  ;;  %s281_s23 = scalar_lea.vmem %s716_s0, %s581_s20 }
   0xf   : > { %v623_v1 = vld [vmem:[%s294_s19 + $0x8] sm:$0xff]   ;;  %v624_v2 = vld [vmem:[%s294_s19] sm:$0xff]   ;;  %s301_s26 = scalar_lea.vmem %s718_s2, %s725_s12  ;;  %s313_s29 = scalar_lea.vmem %s719_s3, %s581_s20 }
  0x10   : > { %590 = vmatpush3.bf16.msra.mxu0 %v623_v1  ;;  %v625_v3 = vld [vmem:[%s281_s23] sm:$0xff]  }
  0x11   : > { %591 = vmatprep.subr.bf16.mxu0 %v650_v0  ;;  %v576_v12 = vld [vmem:[%s301_s26] ss:$0 sm:$0xff] }
  0x14   : > { %592 = vmatpush3.bf16.msra.mxu0 %v624_v2  ;;  %v323_v4 = vld [vmem:[#allocation2] sm:$0xff]  ;;  %v324_v8 = vld [vmem:[#allocation2 + $0x8] sm:$0xff] }
  0x17   : > { %594 = vmatmul.mubr.msk.bf16.vlgmr.msra.gmra.mxu0 %vm320_vm0, %v625_v3 }
  0xd7   : > { %v386_v5 = vpop.f32.mrf.mxu0 }
  0xd8   : > { %v393_v6 = vadd.f32 %v386_v5, %v323_v4 }
  0xd9   : > { %v595_v7 = vpop.f32.mrf.mxu0 }
  0xda   : > { %395 = vst.msk [vmem:[#allocation2] sm:$0xff] %vm320_vm0, %v393_v6 }
  0xdb   : > { %v389_v9 = vpop.f32.mrf.mxu0 }
  0xdc   : > { %v394_v10 = vadd.f32 %v389_v9, %v324_v8 }
  0xdd   : > { %v596_v11 = vpop.f32.mrf.mxu0 }
  0xde   : > { %396 = vst.msk [vmem:[#allocation2 + $0x8] sm:$0xff] %vm320_vm0, %v394_v10 }
  0xe1   : > { %v400_v13 = vld [vmem:[#allocation2] sm:$0xff] }
  0xe2   : > { %v409_v14 = vadd.f32 %v576_v12, %v400_v13 }
  0xe4   : > { %v584_v15 = vpack.c.bf16 %v409_v14, %v409_v14 }
  0xe5   : > { %v401_v16 = vld [vmem:[#allocation2 + $0x8] sm:$0xff] }
  0xe6   : > { %420 = vst.msk [vmem:[%s313_s29] sm:$0xf] %vm419_vm2, %v584_v15  ;;  %v410_v17 = vadd.f32 %v576_v12, %v401_v16 }
  0xe8   : > { %v585_v18 = vpack.c.bf16 %v410_v17, %v410_v17 }
  0xea   : > { %421 = vst.msk [vmem:[%s313_s29 + $0x4] sm:$0xf] %vm419_vm2, %v585_v18 }
  0xeb PF: > { %s13_s14 = sadd.s32 1, %s648_s14   ;;  %s720_s12 = smov %s644_s13 }
  0xec   : > { %p10_p5 = scmp.ge.s32.totalorder %s13_s14, 5   ;;  %s721_s13 = smov %s723_s15 }
  0xee   :  { %12 = sbr.rel (!%p10_p5) target bundleno = 2 (0x2), region = 76 }

// kernel: _forward_cross.5
= control target key start
LH: loop header
LB: loop body
LE: loop exit
PB: predicated region body
PF: predicated region fallthrough
CT: control target
= control target key end

     0   :  { %v175_v1 = vmov 0.0   ;;  %vm176_vm0 = vmmov 0   ;;  %vm20_vm1 = vcmask 261120   ;;  %s222_s0 = inlined_call_operand.vmem [shape: bf16[16,32], index: 0, kind: input, shape index: {}]   ;;  %s223_s1 = inlined_call_operand.vmem [shape: bf16[32,32], index: 1, kind: input, shape index: {}]   ;;  %s224_s2 = inlined_call_operand.vmem [shape: f32[1,32], index: 2, kind: input, shape index: {}]   ;;  %s225_s3 = inlined_call_operand.hbm [shape: f32[1,16,32], index: 3, kind: output, shape index: {}]  }
   0x1   :  { %v150_v0 = vld [vmem:[%s223_s1 + $0x8] sm:$0xff]   ;;  %137 = vmatprep.subr.bf16.mxu0 %v175_v1  ;;  %v151_v2 = vld [vmem:[%s223_s1] sm:$0xff]   ;;  %141 = vmatprep.mubr.msk.bf16.mxu0 %vm176_vm0, %v175_v1  ;;  %21 = vst.msk [vmem:[#allocation2] sm:$0xff] %vm20_vm1, %v175_v1  ;;  %22 = vst.msk [vmem:[#allocation2 + $0x8] sm:$0xff] %vm20_vm1, %v175_v1 }
   0x2   :  { %138 = vmatpush3.bf16.msra.mxu0 %v150_v0 }
   0x3   :  { %139 = vmatprep.subr.bf16.mxu0 %v175_v1 }
   0x4   :  { %8 = vsyncpa [#allocation4], 0  ;;  %v152_v3 = vld [vmem:[%s222_s0] sm:$0xff]   ;;  %s177_s0 = smov [#allocation3]  }
   0x5   :  { %v133_v12 = vld [vmem:[%s224_s2] ss:$0 sm:$0xff]  ;;  %s118_s19 = sshll.u32 %s177_s0, 4  ;;  %s119_s19 = int_to_ptr.vmem [resolvable:$true] %s118_s19 }
   0x6   :  { %140 = vmatpush3.bf16.msra.mxu0 %v151_v2  ;;  %s153_s20 = scalar_lea.vmem %s119_s19, 256  ;;  %p158_p1 = scmp.lt.s32.totalorder %s119_s19, %s119_s19 }
   0x7   :  { %p154_p0 = scmp.ne.s32.totalorder %s119_s19, %s153_s20  ;;  %p159_p2 = scmp.lt.s32.totalorder %s153_s20, %s153_s20 }
   0x8   :  { %v23_v4 = vld [vmem:[#allocation2] sm:$0xff]  ;;  %v24_v8 = vld [vmem:[#allocation2 + $0x8] sm:$0xff] }
   0x9   :  { %142 = vmatmul.mubr.msk.bf16.vlgmr.msra.gmra.mxu0 %vm20_vm1, %v152_v3  ;;  %p160_p3 = por %p159_p2, %p158_p1 }
   0xb   :  { %p161_p4 = pnand %p160_p3, %p154_p0 }
  0xc9   :  { %v86_v5 = vpop.f32.mrf.mxu0 }
  0xca   :  { %v93_v6 = vadd.f32 %v86_v5, %v23_v4 }
  0xcb   :  { %v143_v7 = vpop.f32.mrf.mxu0 }
  0xcc   :  { %95 = vst.msk [vmem:[#allocation2] sm:$0xff] %vm20_vm1, %v93_v6 }
  0xcd   :  { %v89_v9 = vpop.f32.mrf.mxu0 }
  0xce   :  { %v94_v10 = vadd.f32 %v89_v9, %v24_v8 }
  0xcf   :  { %v144_v11 = vpop.f32.mrf.mxu0 }
  0xd0   :  { %96 = vst.msk [vmem:[#allocation2 + $0x8] sm:$0xff] %vm20_vm1, %v94_v10 }
  0xd3   :  { %v100_v13 = vld [vmem:[#allocation2] sm:$0xff] }
  0xd4   :  { %v109_v14 = vadd.f32 %v133_v12, %v100_v13 }
  0xd6   :  { %111 = vst.msk [vmem:[#allocation3] sm:$0xff] %vm20_vm1, %v109_v14 }
  0xd7   :  { %v101_v15 = vld [vmem:[#allocation2 + $0x8] sm:$0xff] }
  0xd8   :  { %v110_v16 = vadd.f32 %v133_v12, %v101_v15 }
  0xda   :  { %112 = vst.msk [vmem:[#allocation3 + $0x8] sm:$0xff] %vm20_vm1, %v110_v16 }
  0xdb   :  { %164 = shalt.err (!%p161_p4)
}
  0xdc   :  { %s178_s21 = smov 128   ;;  %s179_s2 = smov 8  }
  0xdd   :  { %124 = dma.vmem_to_hbm [thread:$0]  %s119_s19, 256, %s225_s3, [#allocation4], %s178_s21, %s178_s21, %s179_s2  }
  0xde   :  { %173 = dma.done.wait [#allocation4], 256  }
  0xdf   :  { %174 = vsyncadd [#allocation4], 4294967040 }
  0xe0   :  { %128 = vsyncpa [#allocation4], 1 }

// kernel: _forward_cross.4
= control target key start
LH: loop header
LB: loop body
LE: loop exit
PB: predicated region body
PF: predicated region fallthrough
CT: control target
= control target key end

     0   :  { %s1204_s12 = smov 0   ;;  %s1206_s13 = smov 0   ;;  %s1359_s0 = inlined_call_operand.vmem [shape: bf16[3,2,8,32], index: 0, kind: input, shape index: {}, may-alias: {0,1,2}]   ;;  %s1360_s1 = inlined_call_operand.vmem [shape: bf16[3,2,8,32], index: 1, kind: input, shape index: {}, may-alias: {0,1,2}]   ;;  %s1361_s2 = inlined_call_operand.vmem [shape: bf16[3,2,8,32], index: 2, kind: input, shape index: {}, may-alias: {0,1,2}]   ;;  %s1362_s3 = inlined_call_operand.vmem [shape: bf16[2,8,32], index: 3, kind: output, shape index: {}]  }
   0x1   :  { %s1208_s14 = smov 0  }
   0x2 LB: > { %s32_s15 = sadd.s32 1, %s1168_s13  ;;  %p1004_p0 = scmp.ge.s32.totalorder %s1172_s14, 1  ;;  %s1172_s14 = sphi %s1208_s14, %s13_s14   ;;  %s1168_s13 = sphi %s1206_s13, %s1364_s13   ;;  %s1164_s12 = sphi %s1204_s12, %s1363_s12  }
   0x3   : > { %p34_p1 = scmp.ge.s32.totalorder %s32_s15, 2  ;;  %p192_p2 = scmp.lt.s32.totalorder %s1172_s14, 3 }
   0x5   : > { %s1366_s15 = smov (%p34_p1, %s32_s15), 0  ;;  %p193_p3 = pnand %p1004_p0, %p192_p2 }
   0x6   : > { %p236_p4 = scmp.lt.s32.totalorder (!%p193_p3), %s1164_s12, 1  ;;  %s1178_s23 = smov (!%p193_p3), 120  }
   0x7   : > { %196 = sbr.rel (%p193_p3) target bundleno = 1373 (0x55d), region = 32  ;;  %s1179_s24 = smov (!%p193_p3), 112  }
   0x8   : > { %s1180_s25 = smov (!%p193_p3), 104   ;;  %s1181_s29 = smov (!%p193_p3), 8  }
   0x9   : > { %s1182_s30 = smov (!%p193_p3), 16   ;;  %s1183_s4 = smov (!%p193_p3), 24  }
   0xc   : > { %v1174_v0 = vmov 0.0   ;;  %vm1175_vm0 = vmmov 0   ;;  %s1368_s12 = smov (!%p236_p4, %s1164_s12), 1  ;;  %vm285_vm1 = vcmask 64512   ;;  %vm271_vm2 = vcmask 7168  }
   0xd   : > { %1040 = vmatprep.subr.bf16.mxu0 %v1174_v0  ;;  %1042 = vmatprep.mubr.msk.bf16.mxu0 %vm1175_vm0, %v1174_v0  ;;  %s1228_s16 = sshll.u32 %s1368_s12, 2  ;;  %v1176_v4 = vmov -inf   ;;  %276 = vst.msk [vmem:[#allocation3] sm:$0xff] %vm271_vm2, %v1174_v0  ;;  %277 = vst.msk [vmem:[#allocation3 + $0x8] sm:$0xff] %vm271_vm2, %v1174_v0  ;;  %v1177_v10 = vmov 0   ;;  %vm360_vm3 = vcmask 1043456  }
   0xe   : > { %1046 = vmatprep.subr.bf16.mxu1 %v1174_v0  ;;  %1048 = vmatprep.mubr.msk.bf16.mxu1 %vm1175_vm0, %v1174_v0  ;;  %s942_s19 = scalar_lea.vmem %s1360_s1, %s1228_s16  ;;  %s242_s22 = scalar_lea.vmem %s1359_s0, %s1228_s16  ;;  %272 = vst.msk [vmem:[#allocation2] sm:$0xff] %vm271_vm2, %v1176_v4  ;;  %273 = vst.msk [vmem:[#allocation2 + $0x8] sm:$0xff] %vm271_vm2, %v1176_v4  ;;  %vm280_vm4 = vcmask 261120   ;;  %vm559_vm5 = vcmask 130112   ;;  %vm698_vm6 = vcmask 195712   ;;  %vm837_vm7 = vcmask 261312  }
   0xf   : > { %v1009_v1 = vld [vmem:[%s942_s19 + $0x8] sm:$0xf]  ;;  %v282_v3 = vld [vmem:[%s242_s22] sm:$0xf]  ;;  %274 = vst.msk [vmem:[#allocation2 + $0x10] sm:$0xff] %vm271_vm2, %v1176_v4  ;;  %275 = vst.msk [vmem:[#allocation2 + $0x18] sm:$0xff] %vm271_vm2, %v1176_v4  ;;  %1122 = vset.pattern.permute.xlu0 %v1177_v10  ;;  %1123 = vset.pattern.permute.xlu1 %v1177_v10  ;;  %s946_s28 = scalar_lea.vmem %s1361_s2, %s1228_s16  ;;  %s265_s7 = scalar_lea.vmem %s1362_s3, %s1228_s16 }
  0x10   : > { %v290_v2 = vsel %vm285_vm1, %v1009_v1, 0  ;;  %278 = vst.msk [vmem:[#allocation3 + $0x10] sm:$0xff] %vm271_vm2, %v1174_v0  ;;  %279 = vst.msk [vmem:[#allocation3 + $0x18] sm:$0xff] %vm271_vm2, %v1174_v0  ;;  %v1014_v11 = vcombine.low %v1009_v1, %v1009_v1  ;;  %v1013_v12 = vcombine.low %v282_v3, %v282_v3  ;;  %v1010_v17 = vld [vmem:[%s946_s28 + $0x10] sm:$0xf]  ;;  %vm885_vm8 = vcmask 257024  }
  0x11   : > { %1041 = vmatpush3.bf16.xpose.msra.mxu0 %v290_v2  ;;  %v362_v18 = vsel %vm360_vm3, %v1010_v17, 0  ;;  %v1016_v56 = vcombine.low %v1010_v17, %v1010_v17  ;;  %281 = vst.msk [vmem:[#allocation4] sm:$0xff] %vm280_vm4, %v1174_v0 }
  0x12   : > { %1058 = vmatprep.subr.bf16.mxu0 %v1174_v0  ;;  %422 = vrot.lane.b32.xlu1 %v1014_v11, %s1178_s23 }
  0x13   : > { %1047 = vmatpush3.bf16.msra.mxu1 %v362_v18 }
  0x14   : > { %1052 = vmatprep.subr.bf16.mxu1 %v1174_v0 }
  0x15   : > { %v332_v13 = vld [vmem:[#allocation2] sm:$0xff]  ;;  %v471_v53 = vld [vmem:[#allocation2 + $0x8] sm:$0xff] }
  0x16   : > { %417 = vrot.lane.b32.xlu1 %v1013_v12, %s1178_s23  ;;  %v613_v58 = vld [vmem:[#allocation2 + $0x10] sm:$0xff]  ;;  %v1299_v63 = vld [vmem:[#allocation2 + $0x18] sm:$0xff] }
  0x18   : > { %1043 = vmatmul.mubr.msk.bf16.vlgmr.msra.gmra.mxu0 %vm285_vm1, %v282_v3 }
  0x19   : > { %1060 = vmatprep.mubr.msk.bf16.mxu0 %vm1175_vm0, %v1174_v0 }
  0x1a   : > { %564 = vrot.lane.b32.xlu1 %v1014_v11, %s1179_s24 }
  0x1e   : > { %562 = vrot.lane.b32.xlu1 %v1013_v12, %s1179_s24 }
  0x22   : > { %703 = vrot.lane.b32.xlu1 %v1014_v11, %s1180_s25 }
  0x26   : > { %701 = vrot.lane.b32.xlu1 %v1013_v12, %s1180_s25  ;;  %v404_v12 = vld [vmem:[#allocation4] sm:$0xff] }
  0x84   : > { %v423_v22 = vpop.permute.xlu1 %422 }
  0x85   : > { %v428_v25 = vsel %vm285_vm1, %v423_v22, 0 }
  0x88   : > { %v418_v23 = vpop.permute.xlu1 %417 }
  0x8c   : > { %v565_v27 = vpop.permute.xlu1 %564 }
  0x8d   : > { %v570_v29 = vsel %vm285_vm1, %v565_v27, 0 }
  0x90   : > { %v563_v28 = vpop.permute.xlu1 %562 }
  0x94   : > { %v704_v30 = vpop.permute.xlu1 %703 }
  0x95   : > { %v709_v31 = vsel %vm285_vm1, %v704_v30, 0 }
  0x98   : > { %v702_v32 = vpop.permute.xlu1 %701 }
  0xd8   : > { %v326_v5 = vpop.f32.mrf.mxu0 }
  0xd9   : > { %v333_v6 = vsel %vm285_vm1, %v326_v5, -inf }
  0xda   : > { %334 = vmax.xlane.f32.xlu0 %v333_v6  ;;  %v1044_v7 = vpop.f32.mrf.mxu0 }
  0xdc   : > { %v329_v8 = vpop.f32.mrf.mxu0 }
  0xde   : > { %v1045_v9 = vpop.f32.mrf.mxu0 }
 0x163   : > { %v335_v14 = vpop.xlane.xlu0 %334 }
 0x164   : > { %v336_v15 = vmax.f32 %v332_v13, %v335_v14 }
 0x166   : > { %v337_v16 = vsub.f32 %v332_v13, %v336_v15  ;;  %413 = vst.msk [vmem:[#allocation2] sm:$0xff] %vm271_vm2, %v336_v15  ;;  %342 = vperm.xlu0 %1122, %v336_v15  }
 0x168   : > { %v338_v52 = vmul.f32 1.442695, %v337_v16 }
 0x1e1   : > { %v343_v19 = vpop.permute.xlu0 %342 }
 0x1e2   : > { %v345_v20 = vsub.f32 %v326_v5, %v343_v19 }
 0x1e4   : > { %v346_v21 = vmul.f32 1.442695, %v345_v20 }
 0x1e6   : > { %1126 = vpow2.f32 %v346_v21 }
 0x1e7   : > { %1128 = vpow2.f32 %v338_v52 }
 0x1f3   : > { %v1269_v24 = vpop.eup %1126 }
 0x1f4   : > { %v356_v26 = vpack.c.bf16 %v1269_v24, %v1269_v24  ;;  %v1297_v62 = vpop.eup %1128  ;;  %v350_v4 = vsel %vm285_vm1, %v1269_v24, 0.0 }
 0x1f6   : > { %1049 = vmatmul.mubr.msk.bf16.vlgmr.msra.gmra.mxu1 %vm285_vm1, %v356_v26 }
 0x1f7   : > { %1053 = vmatpush3.bf16.xpose.msra.mxu1 %v428_v25  ;;  %1054 = vmatprep.mubr.msk.bf16.mxu1 %vm1175_vm0, %v1174_v0 }
 0x1f8   : > { %1064 = vmatprep.subr.bf16.mxu1 %v1174_v0 }
 0x1fe   : > { %1055 = vmatmul.mubr.msk.bf16.vlgmr.msra.gmra.mxu1 %vm285_vm1, %v418_v23 }
 0x1ff   : > { %1065 = vmatpush3.bf16.xpose.msra.mxu1 %v570_v29  ;;  %1066 = vmatprep.mubr.msk.bf16.mxu1 %vm1175_vm0, %v1174_v0 }
 0x200   : > { %1076 = vmatprep.subr.bf16.mxu1 %v1174_v0 }
 0x206   : > { %1067 = vmatmul.mubr.msk.bf16.vlgmr.msra.gmra.mxu1 %vm285_vm1, %v563_v28 }
 0x207   : > { %1077 = vmatpush3.bf16.xpose.msra.mxu1 %v709_v31  ;;  %1078 = vmatprep.mubr.msk.bf16.mxu1 %vm1175_vm0, %v1174_v0 }
 0x20e   : > { %1079 = vmatmul.mubr.msk.bf16.vlgmr.msra.gmra.mxu1 %vm285_vm1, %v702_v32 }
 0x2b6   : > { %v1288_v33 = vpop.f32.mrf.mxu1 }
 0x2b8   : > { %v1050_v34 = vpop.f32.mrf.mxu1 }
 0x2ba   : > { %v401_v35 = vpop.f32.mrf.mxu1 }
 0x2bc   : > { %v1051_v36 = vpop.f32.mrf.mxu1 }
 0x2be   : > { %v464_v37 = vpop.f32.mrf.mxu1 }
 0x2bf   : > { %v472_v38 = vsel %vm285_vm1, %v464_v37, -inf }
 0x2c0   : > { %473 = vmax.xlane.f32.xlu1 %v472_v38  ;;  %v1056_v39 = vpop.f32.mrf.mxu1 }
 0x2c2   : > { %v467_v40 = vpop.f32.mrf.mxu1 }
 0x2c4   : > { %v1057_v41 = vpop.f32.mrf.mxu1 }
 0x2c5   : > { %v488_v41 = vld [vmem:[#allocation3 + $0x8] sm:$0xff] }
 0x2c6   : > { %v606_v42 = vpop.f32.mrf.mxu1 }
 0x2c7   : > { %v614_v43 = vsel %vm285_vm1, %v606_v42, -inf }
 0x2c8   : > { %615 = vmax.xlane.f32.xlu0 %v614_v43  ;;  %v1068_v44 = vpop.f32.mrf.mxu1 }
 0x2ca   : > { %v609_v45 = vpop.f32.mrf.mxu1 }
 0x2cb   : > { %v630_v45 = vld [vmem:[#allocation3 + $0x10] sm:$0xff] }
 0x2cc   : > { %v1069_v46 = vpop.f32.mrf.mxu1 }
 0x2ce   : > { %v745_v47 = vpop.f32.mrf.mxu1 }
 0x2cf   : > { %v753_v48 = vsel %vm285_vm1, %v745_v47, -inf }
 0x2d0   : > { %754 = vmax.xlane.f32.xlu1 %v753_v48  ;;  %v1080_v49 = vpop.f32.mrf.mxu1 }
 0x2d2   : > { %v748_v50 = vpop.f32.mrf.mxu1 }
 0x2d3   : > { %v769_v50 = vld [vmem:[#allocation3 + $0x18] sm:$0xff] }
 0x2d4   : > { %v1081_v51 = vpop.f32.mrf.mxu1 }
 0x349   : > { %v474_v54 = vpop.xlane.xlu1 %473 }
 0x34a   : > { %v475_v55 = vmax.f32 %v471_v53, %v474_v54 }
 0x34c   : > { %v476_v57 = vsub.f32 %v471_v53, %v475_v55  ;;  %561 = vst.msk [vmem:[#allocation2 + $0x8] sm:$0xff] %vm271_vm2, %v475_v55  ;;  %481 = vperm.xlu1 %1123, %v475_v55  }
 0x34e   : > { %v477_v27 = vmul.f32 1.442695, %v476_v57 }
 0x350   : > { %499 = vrot.lane.b32.xlu1 %v1016_v56, %s1178_s23 }
 0x351   : > { %v616_v59 = vpop.xlane.xlu0 %615 }
 0x352   : > { %v617_v60 = vmax.f32 %v613_v58, %v616_v59 }
 0x354   : > { %v618_v61 = vsub.f32 %v613_v58, %v617_v60  ;;  %700 = vst.msk [vmem:[#allocation2 + $0x10] sm:$0xff] %vm271_vm2, %v617_v60  ;;  %623 = vperm.xlu0 %1122, %v617_v60  }
 0x356   : > { %v619_v31 = vmul.f32 1.442695, %v618_v61 }
 0x358   : > { %407 = vperm.xlu0 %1122, %v1297_v62  }
 0x359   : > { %v755_v1 = vpop.xlane.xlu1 %754 }
 0x35a   : > { %v1303_v2 = vmax.f32 %v1299_v63, %v755_v1 }
 0x35c   : > { %v757_v3 = vsub.f32 %v1299_v63, %v1303_v2  ;;  %839 = vst.msk [vmem:[#allocation2 + $0x18] sm:$0xff] %vm271_vm2, %v1303_v2  ;;  %762 = vperm.xlu1 %1123, %v1303_v2  }
 0x360   : > { %638 = vrot.lane.b32.xlu1 %v1016_v56, %s1179_s24 }
 0x364   : > { %777 = vrot.lane.b32.xlu1 %v1016_v56, %s1180_s25 }
 0x388   : > { %351 = vadd.xlane.f32.xlu1 %v350_v4 }
 0x3c7   : > { %v482_v5 = vpop.permute.xlu1 %481 }
 0x3c8   : > { %v484_v6 = vsub.f32 %v464_v37, %v482_v5  ;;  %v348_v37 = vld [vmem:[#allocation3] sm:$0xff] }
 0x3c9   : > { %v349_v38 = vmul.f32 %v1297_v62, %v348_v37 }
 0x3ca   : > { %v485_v7 = vmul.f32 1.442695, %v484_v6 }
 0x3cb   : > { %v500_v8 = vpop.permute.xlu1 %499 }
 0x3cc   : > { %1130 = vpow2.f32 %v485_v7  ;;  %v505_v9 = vsel %vm360_vm3, %v500_v8, 0 }
 0x3cd   : > { %1059 = vmatpush3.bf16.msra.mxu0 %v505_v9 }
 0x3ce   : > { %1070 = vmatprep.subr.bf16.mxu0 %v1174_v0 }
 0x3cf   : > { %v624_v10 = vpop.permute.xlu0 %623 }
 0x3d0   : > { %v626_v11 = vsub.f32 %v606_v42, %v624_v10 }
 0x3d2   : > { %v627_v13 = vmul.f32 1.442695, %v626_v11 }
 0x3d3   : > { %v408_v14 = vpop.permute.xlu0 %407 }
 0x3d4   : > { %1132 = vpow2.f32 %v627_v13  ;;  %v410_v15 = vmul.f32 %v408_v14, %v404_v12 }
 0x3d6   : > { %v411_v16 = vadd.f32 %v410_v15, %v1288_v33 }
 0x3d7   : > { %v763_v17 = vpop.permute.xlu1 %762 }
 0x3d8   : > { %412 = vst.msk [vmem:[#allocation4] sm:$0xff] %vm285_vm1, %v411_v16  ;;  %v765_v18 = vsub.f32 %v745_v47, %v763_v17 }
 0x3d9   : > { %v1131_v19 = vpop.eup %1130 }
 0x3da   : > { %v766_v20 = vmul.f32 1.442695, %v765_v18  ;;  %v490_v21 = vsel %vm285_vm1, %v1131_v19, 0.0  ;;  %v495_v22 = vpack.c.bf16 %v1131_v19, %v1131_v19 }
 0x3db   : > { %491 = vadd.xlane.f32.xlu0 %v490_v21  ;;  %v639_v23 = vpop.permute.xlu1 %638 }
 0x3dc   : > { %1134 = vpow2.f32 %v766_v20  ;;  %1061 = vmatmul.mubr.msk.bf16.vlgmr.msra.gmra.mxu0 %vm285_vm1, %v495_v22  ;;  %v644_v24 = vsel %vm360_vm3, %v639_v23, 0 }
 0x3dd   : > { %1071 = vmatpush3.bf16.msra.mxu0 %v644_v24  ;;  %1072 = vmatprep.mubr.msk.bf16.mxu0 %vm1175_vm0, %v1174_v0  ;;  %1136 = vpow2.f32 %v477_v27 }
 0x3de   : > { %1082 = vmatprep.subr.bf16.mxu0 %v1174_v0  ;;  %1138 = vpow2.f32 %v619_v31 }
 0x3df   : > { %v778_v25 = vpop.permute.xlu1 %777  ;;  %v547_v12 = vld [vmem:[#allocation4] sm:$0xff] }
 0x3e0   : > { %v783_v30 = vsel %vm360_vm3, %v778_v25, 0 }
 0x3e1   : > { %v1133_v26 = vpop.eup %1132 }
 0x3e2   : > { %v632_v28 = vsel %vm285_vm1, %v1133_v26, 0.0  ;;  %v637_v29 = vpack.c.bf16 %v1133_v26, %v1133_v26 }
 0x3e3   : > { %633 = vadd.xlane.f32.xlu1 %v632_v28 }
 0x3e4   : > { %1073 = vmatmul.mubr.msk.bf16.vlgmr.msra.gmra.mxu0 %vm285_vm1, %v637_v29 }
 0x3e5   : > { %1083 = vmatpush3.bf16.msra.mxu0 %v783_v30  ;;  %1084 = vmatprep.mubr.msk.bf16.mxu0 %vm1175_vm0, %v1174_v0  ;;  %v758_v0 = vmul.f32 1.442695, %v757_v3 }
 0x3e7   : > { %1140 = vpow2.f32 %v758_v0 }
 0x3e9   : > { %v1135_v32 = vpop.eup %1134 }
 0x3ea   : > { %v771_v33 = vsel %vm285_vm1, %v1135_v32, 0.0  ;;  %v776_v34 = vpack.c.bf16 %v1135_v32, %v1135_v32  ;;  %v1137_v35 = vpop.eup %1136 }
 0x3eb   : > { %772 = vadd.xlane.f32.xlu0 %v771_v33  ;;  %v1139_v36 = vpop.eup %1138  ;;  %v489_v42 = vmul.f32 %v1137_v35, %v488_v41 }
 0x3ec   : > { %1085 = vmatmul.mubr.msk.bf16.vlgmr.msra.gmra.mxu0 %vm285_vm1, %v776_v34  ;;  %v631_v46 = vmul.f32 %v1139_v36, %v630_v45 }
 0x3f4   : > { %550 = vperm.xlu1 %1123, %v1137_v35   ;;  %v1141_v49 = vpop.eup %1140 }
 0x3f5   : > { %v770_v51 = vmul.f32 %v1141_v49, %v769_v50 }
 0x3f8   : > { %689 = vperm.xlu1 %1123, %v1139_v36  }
 0x411   : > { %v352_v39 = vpop.xlane.xlu1 %351 }
 0x412   : > { %v353_v40 = vadd.f32 %v352_v39, %v349_v38 }
 0x414   : > { %355 = vst.msk [vmem:[#allocation3] sm:$0xff] %vm271_vm2, %v353_v40 }
 0x41b   : > { %v844_v54 = vld [vmem:[#allocation3] sm:$0xff] }
 0x41c   : > { %1142 = vrcp.f32 %v844_v54 }
 0x429   : > { %v1143_v61 = vpop.eup %1142 }
 0x464   : > { %v492_v43 = vpop.xlane.xlu0 %491 }
 0x465   : > { %v493_v44 = vadd.f32 %v492_v43, %v489_v42 }
 0x467   : > { %494 = vst.msk [vmem:[#allocation3 + $0x8] sm:$0xff] %vm271_vm2, %v493_v44 }
 0x46c   : > { %v634_v47 = vpop.xlane.xlu1 %633 }
 0x46d   : > { %v635_v48 = vadd.f32 %v634_v47, %v631_v46 }
 0x46e   : > { %v854_v59 = vld [vmem:[#allocation3 + $0x8] sm:$0xff] }
 0x46f   : > { %636 = vst.msk [vmem:[#allocation3 + $0x10] sm:$0xff] %vm271_vm2, %v635_v48 }
 0x470   : > { %v551_v11 = vpop.permute.xlu1 %550 }
 0x471   : > { %v553_v13 = vmul.f32 %v551_v11, %v547_v12 }
 0x474   : > { %v773_v52 = vpop.xlane.xlu0 %772  ;;  %v690_v16 = vpop.permute.xlu1 %689 }
 0x475   : > { %v774_v53 = vadd.f32 %v773_v52, %v770_v51 }
 0x476   : > { %v864_v55 = vld [vmem:[#allocation3 + $0x10] sm:$0xff] }
 0x477   : > { %775 = vst.msk [vmem:[#allocation3 + $0x18] sm:$0xff] %vm271_vm2, %v774_v53  ;;  %1144 = vrcp.f32 %v864_v55 }
 0x478   : > { %1146 = vrcp.f32 %v854_v59 }
 0x47e   : > { %v874_v63 = vld [vmem:[#allocation3 + $0x18] sm:$0xff] }
 0x47f   : > { %1148 = vrcp.f32 %v874_v63 }
 0x484   : > { %v1145_v2 = vpop.eup %1144 }
 0x485   : > { %v1147_v7 = vpop.eup %1146 }
 0x48c   : > { %v1149_v10 = vpop.eup %1148 }
 0x49c   : > { %v541_v56 = vpop.f32.mrf.mxu0 }
 0x49d   : > { %555 = vrot.lane.b32.xlu0 %v541_v56, %s1181_s29 }
 0x49e   : > { %v1062_v57 = vpop.f32.mrf.mxu0 }
 0x4a0   : > { %v544_v58 = vpop.f32.mrf.mxu0 }
 0x4a1   : > { %828 = vperm.xlu0 %1122, %v1141_v49  }
 0x4a2   : > { %v1063_v60 = vpop.f32.mrf.mxu0 }
 0x4a4   : > { %v680_v62 = vpop.f32.mrf.mxu0 }
 0x4a5   : > { %848 = vperm.xlu0 %1122, %v1143_v61   ;;  %694 = vrot.lane.b32.xlu1 %v680_v62, %s1182_s30 }
 0x4a6   : > { %v1074_v1 = vpop.f32.mrf.mxu0 }
 0x4a8   : > { %v683_v3 = vpop.f32.mrf.mxu0 }
 0x4a9   : > { %868 = vperm.xlu0 %1122, %v1145_v2  }
 0x4aa   : > { %v1075_v4 = vpop.f32.mrf.mxu0 }
 0x4ac   : > { %v819_v5 = vpop.f32.mrf.mxu0 }
 0x4ad   : > { %833 = vrot.lane.b32.xlu1 %v819_v5, %s1183_s4 }
 0x4ae   : > { %v1086_v6 = vpop.f32.mrf.mxu0 }
 0x4b0   : > { %v822_v8 = vpop.f32.mrf.mxu0 }
 0x4b1   : > { %858 = vperm.xlu1 %1123, %v1147_v7  }
 0x4b2   : > { %v1087_v9 = vpop.f32.mrf.mxu0 }
 0x4b5   : > { %878 = vperm.xlu1 %1123, %v1149_v10  }
 0x50f   : > { %v556_v14 = vpop.permute.xlu0 %555 }
 0x510   : > { %v558_v15 = vadd.f32 %v556_v14, %v553_v13 }
 0x512   : > { %560 = vst.msk [vmem:[#allocation4] sm:$0xff] %vm559_vm5, %v558_v15 }
 0x517   : > { %v695_v19 = vpop.permute.xlu1 %694 }
 0x519   : > { %v686_v17 = vld [vmem:[#allocation4] sm:$0xff] }
 0x51a   : > { %v692_v18 = vmul.f32 %v690_v16, %v686_v17 }
 0x51c   : > { %v697_v20 = vadd.f32 %v695_v19, %v692_v18  ;;  %v829_v21 = vpop.permute.xlu0 %828 }
 0x51e   : > { %699 = vst.msk [vmem:[#allocation4] sm:$0xff] %vm698_vm6, %v697_v20 }
 0x51f   : > { %v834_v24 = vpop.permute.xlu1 %833 }
 0x520   : > { %v849_v26 = vpop.permute.xlu0 %848 }
 0x524   : > { %v869_v32 = vpop.permute.xlu0 %868 }
 0x525   : > { %v825_v22 = vld [vmem:[#allocation4] sm:$0xff] }
 0x526   : > { %v831_v23 = vmul.f32 %v829_v21, %v825_v22 }
 0x528   : > { %v836_v25 = vadd.f32 %v834_v24, %v831_v23 }
 0x52a   : > { %838 = vst.msk [vmem:[#allocation4] sm:$0xff] %vm837_vm7, %v836_v25 }
 0x52c   : > { %v859_v30 = vpop.permute.xlu1 %858 }
 0x530   : > { %v879_v36 = vpop.permute.xlu1 %878 }
 0x531   : > { %v843_v27 = vld [vmem:[#allocation4] sm:$0xff] }
 0x532   : > { %v851_v28 = vmul.f32 %v849_v26, %v843_v27 }
 0x534   : > { %852 = vst.msk [vmem:[#allocation4] sm:$0xff] %vm285_vm1, %v851_v28 }
 0x53b   : > { %v853_v29 = vld [vmem:[#allocation4] sm:$0xff] }
 0x53c   : > { %v861_v31 = vmul.f32 %v859_v30, %v853_v29 }
 0x53e   : > { %862 = vst.msk [vmem:[#allocation4] sm:$0xff] %vm559_vm5, %v861_v31 }
 0x545   : > { %v863_v33 = vld [vmem:[#allocation4] sm:$0xff] }
 0x546   : > { %v871_v34 = vmul.f32 %v869_v32, %v863_v33 }
 0x548   : > { %872 = vst.msk [vmem:[#allocation4] sm:$0xff] %vm698_vm6, %v871_v34 }
 0x54f   : > { %v873_v35 = vld [vmem:[#allocation4] sm:$0xff] }
 0x550   : > { %v881_v37 = vmul.f32 %v879_v36, %v873_v35 }
 0x552   : > { %882 = vst.msk [vmem:[#allocation4] sm:$0xff] %vm837_vm7, %v881_v37 }
 0x559   : > { %v883_v38 = vld [vmem:[#allocation4] sm:$0xff] }
 0x55a   : > { %v884_v39 = vpack.c.bf16 %v883_v38, %v883_v38 }
 0x55c   : > { %886 = vst.msk [vmem:[%s265_s7] sm:$0xf] %vm885_vm8, %v884_v39 }
 0x55d PF: > { %s13_s14 = sadd.s32 1, %s1172_s14   ;;  %s1363_s12 = smov %s1168_s13 }
 0x55e   : > { %p10_p5 = scmp.ge.s32.totalorder %s13_s14, 4   ;;  %s1364_s13 = smov %s1366_s15 }
 0x560   :  { %12 = sbr.rel (!%p10_p5) target bundleno = 2 (0x2), region = 82 }

</bundles_post_ra>
